<compile_context>
chip_gen: v5e
topology: v5e:2x2
jax: 0.10.0
libtpu: 0.0.40
codegen_flags: <defaults>
</compile_context>

<pallas_src>
import functools
import math

import jax
import jax.numpy as jnp
from jax.experimental import pallas as pl
from jax.experimental.pallas import tpu as pltpu


def mha_kernel(q_ref, k_ref, v_ref,
               wq_ref, bq_ref, wk_ref, bk_ref, wv_ref, bv_ref,
               wo_ref, bo_ref, o_ref, *, num_heads, d_k, batch_block):
    """Fused MHA for `batch_block` batch elements per grid step.

    q_ref/k_ref/v_ref/o_ref : (batch_block, S, D)
    w*_ref                  : (D, D)  stored (in, out)
    b*_ref                  : (1, D)
    """
    wq = wq_ref[...]
    wk = wk_ref[...]
    wv = wv_ref[...]
    wo = wo_ref[...]
    bq = bq_ref[...]
    bk = bk_ref[...]
    bv = bv_ref[...]
    bo = bo_ref[...]
    scale = 1.0 / math.sqrt(d_k)

    # Static unroll over the (small) batch block and heads: every slice is a
    # static lane/sublane slice, weights stay resident across iterations.
    for bb in range(batch_block):
        xq = q_ref[bb]                                            # (S, D)
        xk = k_ref[bb]
        xv = v_ref[bb]

        # --- input projections (MXU, f32 accumulation) ---
        Q = jnp.dot(xq, wq, preferred_element_type=jnp.float32) + bq
        K = jnp.dot(xk, wk, preferred_element_type=jnp.float32) + bk
        V = jnp.dot(xv, wv, preferred_element_type=jnp.float32) + bv

        # --- per-head attention; output projection folded into the head loop ---
        acc = None
        for h in range(num_heads):
            lo = h * d_k
            qh = Q[:, lo:lo + d_k]                                # (S, d_k)
            kh = K[:, lo:lo + d_k]
            vh = V[:, lo:lo + d_k]

            # scores = qh @ kh.T / sqrt(d_k)   (contract the d_k axis of both)
            s = jax.lax.dot_general(
                qh, kh, (((1,), (1,)), ((), ())),
                preferred_element_type=jnp.float32) * scale       # (S, S)

            # numerically-stable softmax along the key axis
            s = s - jnp.max(s, axis=-1, keepdims=True)
            e = jnp.exp(s)
            p = e / jnp.sum(e, axis=-1, keepdims=True)
            # TODO(synk): dropout on p_attn omitted (inference / eval mode).

            ctx_h = jnp.dot(p, vh, preferred_element_type=jnp.float32)   # (S, d_k)
            # x @ Wo == sum_h ctx_h @ Wo[h*d_k:(h+1)*d_k, :]  -> no concat needed
            part = jnp.dot(ctx_h, wo[lo:lo + d_k, :],
                           preferred_element_type=jnp.float32)    # (S, D)
            acc = part if acc is None else acc + part

        o_ref[bb] = (acc + bo).astype(o_ref.dtype)


def mha_forward(query, key, value,
                wq, bq, wk, bk, wv, bv, wo, bo,
                *, num_heads, batch_block=None):
    """Pallas forward of MultiHeadedAttention (mask=None path)."""
    # TODO(synk): mask / masked_fill path not implemented (forward covers mask=None).
    B, S, D = query.shape
    assert D % num_heads == 0
    d_k = D // num_heads

    if batch_block is None:
        # Largest divisor of B up to 8: fattens the grid block to amortize the
        # per-step overhead while leaving >1 step (parallel axis) for larger B.
        batch_block = 1
        for cand in range(min(B, 8), 0, -1):
            if B % cand == 0:
                batch_block = cand
                break
    assert B % batch_block == 0, "batch_block must divide the batch size"
    grid = (B // batch_block,)

    x_spec = pl.BlockSpec((batch_block, S, D), lambda b: (b, 0, 0))
    w_spec = pl.BlockSpec((D, D), lambda b: (0, 0))   # constant -> loaded once
    b_spec = pl.BlockSpec((1, D), lambda b: (0, 0))

    kernel = functools.partial(
        mha_kernel, num_heads=num_heads, d_k=d_k, batch_block=batch_block)

    return pl.pallas_call(
        kernel,
        out_shape=jax.ShapeDtypeStruct((B, S, D), query.dtype),
        grid_spec=pltpu.PrefetchScalarGridSpec(
            num_scalar_prefetch=0,
            grid=grid,
            in_specs=[x_spec, x_spec, x_spec,
                      w_spec, b_spec,   # Wq, bq
                      w_spec, b_spec,   # Wk, bk
                      w_spec, b_spec,   # Wv, bv
                      w_spec, b_spec],  # Wo, bo
            out_specs=pl.BlockSpec((batch_block, S, D), lambda b: (b, 0, 0)),
        ),
        compiler_params=pltpu.CompilerParams(
            dimension_semantics=("parallel",)),
    )(query, key, value, wq, bq, wk, bk, wv, bv, wo, bo)


def mha_reference(query, key, value, wq, bq, wk, bk, wv, bv, wo, bo, num_heads):
    """Pure-JAX reference mirroring the PyTorch forward (mask=None, eval)."""
    B, S, D = query.shape
    d_k = D // num_heads

    def proj(x, w, b):
        y = x @ w + b
        return y.reshape(B, S, num_heads, d_k).transpose(0, 2, 1, 3)  # (B,H,S,dk)

    Q = proj(query, wq, bq)
    K = proj(key, wk, bk)
    V = proj(value, wv, bv)
    scores = jnp.einsum('bhqd,bhkd->bhqk', Q, K) / math.sqrt(d_k)
    p = jax.nn.softmax(scores, axis=-1)
    ctx = jnp.einsum('bhqk,bhkd->bhqd', p, V)
    ctx = ctx.transpose(0, 2, 1, 3).reshape(B, S, D)
    return ctx @ wo + bo


if __name__ == "__main__":
    # Small but lane-dense shapes: d_model = 128 (one full lane width).
    B, S, H, D = 2, 16, 4, 128

    key = jax.random.PRNGKey(0)
    ks = jax.random.split(key, 11)

    query = jax.random.normal(ks[0], (B, S, D), dtype=jnp.float32)
    kkey = jax.random.normal(ks[1], (B, S, D), dtype=jnp.float32)
    value = jax.random.normal(ks[2], (B, S, D), dtype=jnp.float32)

    bound = 1.0 / math.sqrt(D)

    def make_linear(kw, kb):
        w = jax.random.uniform(kw, (D, D), jnp.float32, -bound, bound)
        b = jax.random.uniform(kb, (1, D), jnp.float32, -bound, bound)
        return w, b

    wq, bq = make_linear(ks[3], ks[4])
    wk, bk = make_linear(ks[5], ks[6])
    wv, bv = make_linear(ks[7], ks[8])
    wo, bo = make_linear(ks[9], ks[10])

    out = mha_forward(query, kkey, value, wq, bq, wk, bk, wv, bv, wo, bo,
                      num_heads=H)
    out = jax.block_until_ready(out)

    ref = mha_reference(query, kkey, value, wq, bq, wk, bk, wv, bv, wo, bo, H)
    assert out.shape == (B, S, D)
    assert jnp.allclose(out, ref, atol=2e-3, rtol=2e-3), "mismatch vs reference"

    print("KERNEL_OK")
</pallas_src>

<mosaic_0001>
module attributes {stable_mosaic.version = 11 : i64} {
  func.func @mha_kernel(%arg0: i32, %arg1: memref<2x16x128xf32, #tpu.memory_space<vmem>>, %arg2: memref<2x16x128xf32, #tpu.memory_space<vmem>>, %arg3: memref<2x16x128xf32, #tpu.memory_space<vmem>>, %arg4: memref<128x128xf32, #tpu.memory_space<vmem>>, %arg5: memref<1x128xf32, #tpu.memory_space<vmem>>, %arg6: memref<128x128xf32, #tpu.memory_space<vmem>>, %arg7: memref<1x128xf32, #tpu.memory_space<vmem>>, %arg8: memref<128x128xf32, #tpu.memory_space<vmem>>, %arg9: memref<1x128xf32, #tpu.memory_space<vmem>>, %arg10: memref<128x128xf32, #tpu.memory_space<vmem>>, %arg11: memref<1x128xf32, #tpu.memory_space<vmem>>, %arg12: memref<2x16x128xf32, #tpu.memory_space<vmem>>) attributes {dimension_semantics = [#tpu.dimension_semantics<parallel>], iteration_bounds = array<i64: 1>, scalar_prefetch = 0 : i64, scratch_operands = 0 : i64, tpu.core_type = #tpu.core_type<tc>, window_params = [{transform_indices = @transform_0, window_bounds = array<i64: 2, 16, 128>}, {transform_indices = @transform_1, window_bounds = array<i64: 2, 16, 128>}, {transform_indices = @transform_2, window_bounds = array<i64: 2, 16, 128>}, {pipeline_mode = #tpu.pipeline_mode<synchronous>, transform_indices = @transform_3, window_bounds = array<i64: 128, 128>}, {pipeline_mode = #tpu.pipeline_mode<synchronous>, transform_indices = @transform_4, window_bounds = array<i64: 1, 128>}, {pipeline_mode = #tpu.pipeline_mode<synchronous>, transform_indices = @transform_5, window_bounds = array<i64: 128, 128>}, {pipeline_mode = #tpu.pipeline_mode<synchronous>, transform_indices = @transform_6, window_bounds = array<i64: 1, 128>}, {pipeline_mode = #tpu.pipeline_mode<synchronous>, transform_indices = @transform_7, window_bounds = array<i64: 128, 128>}, {pipeline_mode = #tpu.pipeline_mode<synchronous>, transform_indices = @transform_8, window_bounds = array<i64: 1, 128>}, {pipeline_mode = #tpu.pipeline_mode<synchronous>, transform_indices = @transform_9, window_bounds = array<i64: 128, 128>}, {pipeline_mode = #tpu.pipeline_mode<synchronous>, transform_indices = @transform_10, window_bounds = array<i64: 1, 128>}, {transform_indices = @transform_11, window_bounds = array<i64: 2, 16, 128>}]} {
    %c0 = arith.constant 0 : index
    %c0_0 = arith.constant 0 : index
    %0 = vector.load %arg4[%c0, %c0_0] : memref<128x128xf32, #tpu.memory_space<vmem>>, vector<128x128xf32>
    %c0_1 = arith.constant 0 : index
    %c0_2 = arith.constant 0 : index
    %1 = vector.load %arg6[%c0_1, %c0_2] : memref<128x128xf32, #tpu.memory_space<vmem>>, vector<128x128xf32>
    %c0_3 = arith.constant 0 : index
    %c0_4 = arith.constant 0 : index
    %2 = vector.load %arg8[%c0_3, %c0_4] : memref<128x128xf32, #tpu.memory_space<vmem>>, vector<128x128xf32>
    %c0_5 = arith.constant 0 : index
    %c0_6 = arith.constant 0 : index
    %3 = vector.load %arg10[%c0_5, %c0_6] : memref<128x128xf32, #tpu.memory_space<vmem>>, vector<128x128xf32>
    %c0_7 = arith.constant 0 : index
    %c0_8 = arith.constant 0 : index
    %4 = vector.load %arg5[%c0_7, %c0_8] : memref<1x128xf32, #tpu.memory_space<vmem>>, vector<1x128xf32>
    %c0_9 = arith.constant 0 : index
    %c0_10 = arith.constant 0 : index
    %5 = vector.load %arg7[%c0_9, %c0_10] : memref<1x128xf32, #tpu.memory_space<vmem>>, vector<1x128xf32>
    %c0_11 = arith.constant 0 : index
    %c0_12 = arith.constant 0 : index
    %6 = vector.load %arg9[%c0_11, %c0_12] : memref<1x128xf32, #tpu.memory_space<vmem>>, vector<1x128xf32>
    %c0_13 = arith.constant 0 : index
    %c0_14 = arith.constant 0 : index
    %7 = vector.load %arg11[%c0_13, %c0_14] : memref<1x128xf32, #tpu.memory_space<vmem>>, vector<1x128xf32>
    %c0_15 = arith.constant 0 : index
    %c0_16 = arith.constant 0 : index
    %c0_17 = arith.constant 0 : index
    %8 = vector.load %arg1[%c0_15, %c0_16, %c0_17] : memref<2x16x128xf32, #tpu.memory_space<vmem>>, vector<1x16x128xf32>
    %9 = vector.shape_cast %8 : vector<1x16x128xf32> to vector<16x128xf32>
    %c0_18 = arith.constant 0 : index
    %c0_19 = arith.constant 0 : index
    %c0_20 = arith.constant 0 : index
    %10 = vector.load %arg2[%c0_18, %c0_19, %c0_20] : memref<2x16x128xf32, #tpu.memory_space<vmem>>, vector<1x16x128xf32>
    %11 = vector.shape_cast %10 : vector<1x16x128xf32> to vector<16x128xf32>
    %c0_21 = arith.constant 0 : index
    %c0_22 = arith.constant 0 : index
    %c0_23 = arith.constant 0 : index
    %12 = vector.load %arg3[%c0_21, %c0_22, %c0_23] : memref<2x16x128xf32, #tpu.memory_space<vmem>>, vector<1x16x128xf32>
    %13 = vector.shape_cast %12 : vector<1x16x128xf32> to vector<16x128xf32>
    %cst = arith.constant dense<0.000000e+00> : vector<16x128xf32>
    %14 = tpu.matmul %9, %0, %cst {dimension_numbers = #tpu.dot_dimension_numbers<[1], [0], [0], [1], [0, 0, 1, 1], [], []>} : vector<16x128xf32>, vector<128x128xf32>, vector<16x128xf32> -> vector<16x128xf32>
    %15 = vector.broadcast %4 : vector<1x128xf32> to vector<16x128xf32>
    %16 = arith.addf %14, %15 : vector<16x128xf32>
    %cst_24 = arith.constant dense<0.000000e+00> : vector<16x128xf32>
    %17 = tpu.matmul %11, %1, %cst_24 {dimension_numbers = #tpu.dot_dimension_numbers<[1], [0], [0], [1], [0, 0, 1, 1], [], []>} : vector<16x128xf32>, vector<128x128xf32>, vector<16x128xf32> -> vector<16x128xf32>
    %18 = vector.broadcast %5 : vector<1x128xf32> to vector<16x128xf32>
    %19 = arith.addf %17, %18 : vector<16x128xf32>
    %cst_25 = arith.constant dense<0.000000e+00> : vector<16x128xf32>
    %20 = tpu.matmul %13, %2, %cst_25 {dimension_numbers = #tpu.dot_dimension_numbers<[1], [0], [0], [1], [0, 0, 1, 1], [], []>} : vector<16x128xf32>, vector<128x128xf32>, vector<16x128xf32> -> vector<16x128xf32>
    %21 = vector.broadcast %6 : vector<1x128xf32> to vector<16x128xf32>
    %22 = arith.addf %20, %21 : vector<16x128xf32>
    %23 = vector.extract_strided_slice %16 {offsets = [0, 0], sizes = [16, 32], strides = [1, 1]} : vector<16x128xf32> to vector<16x32xf32>
    %24 = vector.extract_strided_slice %19 {offsets = [0, 0], sizes = [16, 32], strides = [1, 1]} : vector<16x128xf32> to vector<16x32xf32>
    %25 = vector.extract_strided_slice %22 {offsets = [0, 0], sizes = [16, 32], strides = [1, 1]} : vector<16x128xf32> to vector<16x32xf32>
    %cst_26 = arith.constant dense<0.000000e+00> : vector<16x16xf32>
    %26 = tpu.matmul %23, %24, %cst_26 {dimension_numbers = #tpu.dot_dimension_numbers<[1], [1], [0], [0], [0, 0, 1, 0], [], []>} : vector<16x32xf32>, vector<16x32xf32>, vector<16x16xf32> -> vector<16x16xf32>
    %cst_27 = arith.constant 0.176776692 : f32
    %27 = vector.broadcast %cst_27 : f32 to vector<16x16xf32>
    %28 = arith.mulf %26, %27 : vector<16x16xf32>
    %cst_28 = arith.constant dense<0xFF800000> : vector<16xf32>
    %29 = vector.multi_reduction <maximumf>, %28, %cst_28 [1] : vector<16x16xf32> to vector<16xf32>
    %30 = vector.shape_cast %29 : vector<16xf32> to vector<16x1xf32>
    %31 = vector.broadcast %30 : vector<16x1xf32> to vector<16x16xf32>
    %32 = arith.subf %28, %31 : vector<16x16xf32>
    %33 = math.exp %32 : vector<16x16xf32>
    %cst_29 = arith.constant dense<0.000000e+00> : vector<16xf32>
    %34 = vector.multi_reduction <add>, %33, %cst_29 [1] : vector<16x16xf32> to vector<16xf32>
    %35 = vector.shape_cast %34 : vector<16xf32> to vector<16x1xf32>
    %36 = vector.broadcast %35 : vector<16x1xf32> to vector<16x16xf32>
    %37 = arith.divf %33, %36 : vector<16x16xf32>
    %cst_30 = arith.constant dense<0.000000e+00> : vector<16x32xf32>
    %38 = tpu.matmul %37, %25, %cst_30 {dimension_numbers = #tpu.dot_dimension_numbers<[1], [0], [0], [1], [0, 0, 1, 1], [], []>} : vector<16x16xf32>, vector<16x32xf32>, vector<16x32xf32> -> vector<16x32xf32>
    %39 = vector.extract_strided_slice %3 {offsets = [0, 0], sizes = [32, 128], strides = [1, 1]} : vector<128x128xf32> to vector<32x128xf32>
    %cst_31 = arith.constant dense<0.000000e+00> : vector<16x128xf32>
    %40 = tpu.matmul %38, %39, %cst_31 {dimension_numbers = #tpu.dot_dimension_numbers<[1], [0], [0], [1], [0, 0, 1, 1], [], []>} : vector<16x32xf32>, vector<32x128xf32>, vector<16x128xf32> -> vector<16x128xf32>
    %41 = vector.extract_strided_slice %16 {offsets = [0, 32], sizes = [16, 32], strides = [1, 1]} : vector<16x128xf32> to vector<16x32xf32>
    %42 = vector.extract_strided_slice %19 {offsets = [0, 32], sizes = [16, 32], strides = [1, 1]} : vector<16x128xf32> to vector<16x32xf32>
    %43 = vector.extract_strided_slice %22 {offsets = [0, 32], sizes = [16, 32], strides = [1, 1]} : vector<16x128xf32> to vector<16x32xf32>
    %cst_32 = arith.constant dense<0.000000e+00> : vector<16x16xf32>
    %44 = tpu.matmul %41, %42, %cst_32 {dimension_numbers = #tpu.dot_dimension_numbers<[1], [1], [0], [0], [0, 0, 1, 0], [], []>} : vector<16x32xf32>, vector<16x32xf32>, vector<16x16xf32> -> vector<16x16xf32>
    %cst_33 = arith.constant 0.176776692 : f32
    %45 = vector.broadcast %cst_33 : f32 to vector<16x16xf32>
    %46 = arith.mulf %44, %45 : vector<16x16xf32>
    %cst_34 = arith.constant dense<0xFF800000> : vector<16xf32>
    %47 = vector.multi_reduction <maximumf>, %46, %cst_34 [1] : vector<16x16xf32> to vector<16xf32>
    %48 = vector.shape_cast %47 : vector<16xf32> to vector<16x1xf32>
    %49 = vector.broadcast %48 : vector<16x1xf32> to vector<16x16xf32>
    %50 = arith.subf %46, %49 : vector<16x16xf32>
    %51 = math.exp %50 : vector<16x16xf32>
    %cst_35 = arith.constant dense<0.000000e+00> : vector<16xf32>
    %52 = vector.multi_reduction <add>, %51, %cst_35 [1] : vector<16x16xf32> to vector<16xf32>
    %53 = vector.shape_cast %52 : vector<16xf32> to vector<16x1xf32>
    %54 = vector.broadcast %53 : vector<16x1xf32> to vector<16x16xf32>
    %55 = arith.divf %51, %54 : vector<16x16xf32>
    %cst_36 = arith.constant dense<0.000000e+00> : vector<16x32xf32>
    %56 = tpu.matmul %55, %43, %cst_36 {dimension_numbers = #tpu.dot_dimension_numbers<[1], [0], [0], [1], [0, 0, 1, 1], [], []>} : vector<16x16xf32>, vector<16x32xf32>, vector<16x32xf32> -> vector<16x32xf32>
    %57 = vector.extract_strided_slice %3 {offsets = [32, 0], sizes = [32, 128], strides = [1, 1]} : vector<128x128xf32> to vector<32x128xf32>
    %cst_37 = arith.constant dense<0.000000e+00> : vector<16x128xf32>
    %58 = tpu.matmul %56, %57, %cst_37 {dimension_numbers = #tpu.dot_dimension_numbers<[1], [0], [0], [1], [0, 0, 1, 1], [], []>} : vector<16x32xf32>, vector<32x128xf32>, vector<16x128xf32> -> vector<16x128xf32>
    %59 = arith.addf %40, %58 : vector<16x128xf32>
    %60 = vector.extract_strided_slice %16 {offsets = [0, 64], sizes = [16, 32], strides = [1, 1]} : vector<16x128xf32> to vector<16x32xf32>
    %61 = vector.extract_strided_slice %19 {offsets = [0, 64], sizes = [16, 32], strides = [1, 1]} : vector<16x128xf32> to vector<16x32xf32>
    %62 = vector.extract_strided_slice %22 {offsets = [0, 64], sizes = [16, 32], strides = [1, 1]} : vector<16x128xf32> to vector<16x32xf32>
    %cst_38 = arith.constant dense<0.000000e+00> : vector<16x16xf32>
    %63 = tpu.matmul %60, %61, %cst_38 {dimension_numbers = #tpu.dot_dimension_numbers<[1], [1], [0], [0], [0, 0, 1, 0], [], []>} : vector<16x32xf32>, vector<16x32xf32>, vector<16x16xf32> -> vector<16x16xf32>
    %cst_39 = arith.constant 0.176776692 : f32
    %64 = vector.broadcast %cst_39 : f32 to vector<16x16xf32>
    %65 = arith.mulf %63, %64 : vector<16x16xf32>
    %cst_40 = arith.constant dense<0xFF800000> : vector<16xf32>
    %66 = vector.multi_reduction <maximumf>, %65, %cst_40 [1] : vector<16x16xf32> to vector<16xf32>
    %67 = vector.shape_cast %66 : vector<16xf32> to vector<16x1xf32>
    %68 = vector.broadcast %67 : vector<16x1xf32> to vector<16x16xf32>
    %69 = arith.subf %65, %68 : vector<16x16xf32>
    %70 = math.exp %69 : vector<16x16xf32>
    %cst_41 = arith.constant dense<0.000000e+00> : vector<16xf32>
    %71 = vector.multi_reduction <add>, %70, %cst_41 [1] : vector<16x16xf32> to vector<16xf32>
    %72 = vector.shape_cast %71 : vector<16xf32> to vector<16x1xf32>
    %73 = vector.broadcast %72 : vector<16x1xf32> to vector<16x16xf32>
    %74 = arith.divf %70, %73 : vector<16x16xf32>
    %cst_42 = arith.constant dense<0.000000e+00> : vector<16x32xf32>
    %75 = tpu.matmul %74, %62, %cst_42 {dimension_numbers = #tpu.dot_dimension_numbers<[1], [0], [0], [1], [0, 0, 1, 1], [], []>} : vector<16x16xf32>, vector<16x32xf32>, vector<16x32xf32> -> vector<16x32xf32>
    %76 = vector.extract_strided_slice %3 {offsets = [64, 0], sizes = [32, 128], strides = [1, 1]} : vector<128x128xf32> to vector<32x128xf32>
    %cst_43 = arith.constant dense<0.000000e+00> : vector<16x128xf32>
    %77 = tpu.matmul %75, %76, %cst_43 {dimension_numbers = #tpu.dot_dimension_numbers<[1], [0], [0], [1], [0, 0, 1, 1], [], []>} : vector<16x32xf32>, vector<32x128xf32>, vector<16x128xf32> -> vector<16x128xf32>
    %78 = arith.addf %59, %77 : vector<16x128xf32>
    %79 = vector.extract_strided_slice %16 {offsets = [0, 96], sizes = [16, 32], strides = [1, 1]} : vector<16x128xf32> to vector<16x32xf32>
    %80 = vector.extract_strided_slice %19 {offsets = [0, 96], sizes = [16, 32], strides = [1, 1]} : vector<16x128xf32> to vector<16x32xf32>
    %81 = vector.extract_strided_slice %22 {offsets = [0, 96], sizes = [16, 32], strides = [1, 1]} : vector<16x128xf32> to vector<16x32xf32>
    %cst_44 = arith.constant dense<0.000000e+00> : vector<16x16xf32>
    %82 = tpu.matmul %79, %80, %cst_44 {dimension_numbers = #tpu.dot_dimension_numbers<[1], [1], [0], [0], [0, 0, 1, 0], [], []>} : vector<16x32xf32>, vector<16x32xf32>, vector<16x16xf32> -> vector<16x16xf32>
    %cst_45 = arith.constant 0.176776692 : f32
    %83 = vector.broadcast %cst_45 : f32 to vector<16x16xf32>
    %84 = arith.mulf %82, %83 : vector<16x16xf32>
    %cst_46 = arith.constant dense<0xFF800000> : vector<16xf32>
    %85 = vector.multi_reduction <maximumf>, %84, %cst_46 [1] : vector<16x16xf32> to vector<16xf32>
    %86 = vector.shape_cast %85 : vector<16xf32> to vector<16x1xf32>
    %87 = vector.broadcast %86 : vector<16x1xf32> to vector<16x16xf32>
    %88 = arith.subf %84, %87 : vector<16x16xf32>
    %89 = math.exp %88 : vector<16x16xf32>
    %cst_47 = arith.constant dense<0.000000e+00> : vector<16xf32>
    %90 = vector.multi_reduction <add>, %89, %cst_47 [1] : vector<16x16xf32> to vector<16xf32>
    %91 = vector.shape_cast %90 : vector<16xf32> to vector<16x1xf32>
    %92 = vector.broadcast %91 : vector<16x1xf32> to vector<16x16xf32>
    %93 = arith.divf %89, %92 : vector<16x16xf32>
    %cst_48 = arith.constant dense<0.000000e+00> : vector<16x32xf32>
    %94 = tpu.matmul %93, %81, %cst_48 {dimension_numbers = #tpu.dot_dimension_numbers<[1], [0], [0], [1], [0, 0, 1, 1], [], []>} : vector<16x16xf32>, vector<16x32xf32>, vector<16x32xf32> -> vector<16x32xf32>
    %95 = vector.extract_strided_slice %3 {offsets = [96, 0], sizes = [32, 128], strides = [1, 1]} : vector<128x128xf32> to vector<32x128xf32>
    %cst_49 = arith.constant dense<0.000000e+00> : vector<16x128xf32>
    %96 = tpu.matmul %94, %95, %cst_49 {dimension_numbers = #tpu.dot_dimension_numbers<[1], [0], [0], [1], [0, 0, 1, 1], [], []>} : vector<16x32xf32>, vector<32x128xf32>, vector<16x128xf32> -> vector<16x128xf32>
    %97 = arith.addf %78, %96 : vector<16x128xf32>
    %98 = vector.broadcast %7 : vector<1x128xf32> to vector<16x128xf32>
    %99 = arith.addf %97, %98 : vector<16x128xf32>
    %c0_50 = arith.constant 0 : index
    %c0_51 = arith.constant 0 : index
    %c0_52 = arith.constant 0 : index
    %100 = vector.load %arg12[%c0_50, %c0_51, %c0_52] : memref<2x16x128xf32, #tpu.memory_space<vmem>>, vector<1x16x128xf32>
    %101 = vector.shape_cast %100 : vector<1x16x128xf32> to vector<16x128xf32>
    %102 = vector.shape_cast %99 : vector<16x128xf32> to vector<1x16x128xf32>
    tpu.vector_store %arg12[%c0_50, %c0_51, %c0_52], %102 {strides = array<i32>} : memref<2x16x128xf32, #tpu.memory_space<vmem>>, vector<1x16x128xf32>,
    %c1 = arith.constant 1 : index
    %c0_53 = arith.constant 0 : index
    %c0_54 = arith.constant 0 : index
    %103 = vector.load %arg1[%c1, %c0_53, %c0_54] : memref<2x16x128xf32, #tpu.memory_space<vmem>>, vector<1x16x128xf32>
    %104 = vector.shape_cast %103 : vector<1x16x128xf32> to vector<16x128xf32>
    %c1_55 = arith.constant 1 : index
    %c0_56 = arith.constant 0 : index
    %c0_57 = arith.constant 0 : index
    %105 = vector.load %arg2[%c1_55, %c0_56, %c0_57] : memref<2x16x128xf32, #tpu.memory_space<vmem>>, vector<1x16x128xf32>
    %106 = vector.shape_cast %105 : vector<1x16x128xf32> to vector<16x128xf32>
    %c1_58 = arith.constant 1 : index
    %c0_59 = arith.constant 0 : index
    %c0_60 = arith.constant 0 : index
    %107 = vector.load %arg3[%c1_58, %c0_59, %c0_60] : memref<2x16x128xf32, #tpu.memory_space<vmem>>, vector<1x16x128xf32>
    %108 = vector.shape_cast %107 : vector<1x16x128xf32> to vector<16x128xf32>
    %cst_61 = arith.constant dense<0.000000e+00> : vector<16x128xf32>
    %109 = tpu.matmul %104, %0, %cst_61 {dimension_numbers = #tpu.dot_dimension_numbers<[1], [0], [0], [1], [0, 0, 1, 1], [], []>} : vector<16x128xf32>, vector<128x128xf32>, vector<16x128xf32> -> vector<16x128xf32>
    %110 = vector.broadcast %4 : vector<1x128xf32> to vector<16x128xf32>
    %111 = arith.addf %109, %110 : vector<16x128xf32>
    %cst_62 = arith.constant dense<0.000000e+00> : vector<16x128xf32>
    %112 = tpu.matmul %106, %1, %cst_62 {dimension_numbers = #tpu.dot_dimension_numbers<[1], [0], [0], [1], [0, 0, 1, 1], [], []>} : vector<16x128xf32>, vector<128x128xf32>, vector<16x128xf32> -> vector<16x128xf32>
    %113 = vector.broadcast %5 : vector<1x128xf32> to vector<16x128xf32>
    %114 = arith.addf %112, %113 : vector<16x128xf32>
    %cst_63 = arith.constant dense<0.000000e+00> : vector<16x128xf32>
    %115 = tpu.matmul %108, %2, %cst_63 {dimension_numbers = #tpu.dot_dimension_numbers<[1], [0], [0], [1], [0, 0, 1, 1], [], []>} : vector<16x128xf32>, vector<128x128xf32>, vector<16x128xf32> -> vector<16x128xf32>
    %116 = vector.broadcast %6 : vector<1x128xf32> to vector<16x128xf32>
    %117 = arith.addf %115, %116 : vector<16x128xf32>
    %118 = vector.extract_strided_slice %111 {offsets = [0, 0], sizes = [16, 32], strides = [1, 1]} : vector<16x128xf32> to vector<16x32xf32>
    %119 = vector.extract_strided_slice %114 {offsets = [0, 0], sizes = [16, 32], strides = [1, 1]} : vector<16x128xf32> to vector<16x32xf32>
    %120 = vector.extract_strided_slice %117 {offsets = [0, 0], sizes = [16, 32], strides = [1, 1]} : vector<16x128xf32> to vector<16x32xf32>
    %cst_64 = arith.constant dense<0.000000e+00> : vector<16x16xf32>
    %121 = tpu.matmul %118, %119, %cst_64 {dimension_numbers = #tpu.dot_dimension_numbers<[1], [1], [0], [0], [0, 0, 1, 0], [], []>} : vector<16x32xf32>, vector<16x32xf32>, vector<16x16xf32> -> vector<16x16xf32>
    %cst_65 = arith.constant 0.176776692 : f32
    %122 = vector.broadcast %cst_65 : f32 to vector<16x16xf32>
    %123 = arith.mulf %121, %122 : vector<16x16xf32>
    %cst_66 = arith.constant dense<0xFF800000> : vector<16xf32>
    %124 = vector.multi_reduction <maximumf>, %123, %cst_66 [1] : vector<16x16xf32> to vector<16xf32>
    %125 = vector.shape_cast %124 : vector<16xf32> to vector<16x1xf32>
    %126 = vector.broadcast %125 : vector<16x1xf32> to vector<16x16xf32>
    %127 = arith.subf %123, %126 : vector<16x16xf32>
    %128 = math.exp %127 : vector<16x16xf32>
    %cst_67 = arith.constant dense<0.000000e+00> : vector<16xf32>
    %129 = vector.multi_reduction <add>, %128, %cst_67 [1] : vector<16x16xf32> to vector<16xf32>
    %130 = vector.shape_cast %129 : vector<16xf32> to vector<16x1xf32>
    %131 = vector.broadcast %130 : vector<16x1xf32> to vector<16x16xf32>
    %132 = arith.divf %128, %131 : vector<16x16xf32>
    %cst_68 = arith.constant dense<0.000000e+00> : vector<16x32xf32>
    %133 = tpu.matmul %132, %120, %cst_68 {dimension_numbers = #tpu.dot_dimension_numbers<[1], [0], [0], [1], [0, 0, 1, 1], [], []>} : vector<16x16xf32>, vector<16x32xf32>, vector<16x32xf32> -> vector<16x32xf32>
    %134 = vector.extract_strided_slice %3 {offsets = [0, 0], sizes = [32, 128], strides = [1, 1]} : vector<128x128xf32> to vector<32x128xf32>
    %cst_69 = arith.constant dense<0.000000e+00> : vector<16x128xf32>
    %135 = tpu.matmul %133, %134, %cst_69 {dimension_numbers = #tpu.dot_dimension_numbers<[1], [0], [0], [1], [0, 0, 1, 1], [], []>} : vector<16x32xf32>, vector<32x128xf32>, vector<16x128xf32> -> vector<16x128xf32>
    %136 = vector.extract_strided_slice %111 {offsets = [0, 32], sizes = [16, 32], strides = [1, 1]} : vector<16x128xf32> to vector<16x32xf32>
    %137 = vector.extract_strided_slice %114 {offsets = [0, 32], sizes = [16, 32], strides = [1, 1]} : vector<16x128xf32> to vector<16x32xf32>
    %138 = vector.extract_strided_slice %117 {offsets = [0, 32], sizes = [16, 32], strides = [1, 1]} : vector<16x128xf32> to vector<16x32xf32>
    %cst_70 = arith.constant dense<0.000000e+00> : vector<16x16xf32>
    %139 = tpu.matmul %136, %137, %cst_70 {dimension_numbers = #tpu.dot_dimension_numbers<[1], [1], [0], [0], [0, 0, 1, 0], [], []>} : vector<16x32xf32>, vector<16x32xf32>, vector<16x16xf32> -> vector<16x16xf32>
    %cst_71 = arith.constant 0.176776692 : f32
    %140 = vector.broadcast %cst_71 : f32 to vector<16x16xf32>
    %141 = arith.mulf %139, %140 : vector<16x16xf32>
    %cst_72 = arith.constant dense<0xFF800000> : vector<16xf32>
    %142 = vector.multi_reduction <maximumf>, %141, %cst_72 [1] : vector<16x16xf32> to vector<16xf32>
    %143 = vector.shape_cast %142 : vector<16xf32> to vector<16x1xf32>
    %144 = vector.broadcast %143 : vector<16x1xf32> to vector<16x16xf32>
    %145 = arith.subf %141, %144 : vector<16x16xf32>
    %146 = math.exp %145 : vector<16x16xf32>
    %cst_73 = arith.constant dense<0.000000e+00> : vector<16xf32>
    %147 = vector.multi_reduction <add>, %146, %cst_73 [1] : vector<16x16xf32> to vector<16xf32>
    %148 = vector.shape_cast %147 : vector<16xf32> to vector<16x1xf32>
    %149 = vector.broadcast %148 : vector<16x1xf32> to vector<16x16xf32>
    %150 = arith.divf %146, %149 : vector<16x16xf32>
    %cst_74 = arith.constant dense<0.000000e+00> : vector<16x32xf32>
    %151 = tpu.matmul %150, %138, %cst_74 {dimension_numbers = #tpu.dot_dimension_numbers<[1], [0], [0], [1], [0, 0, 1, 1], [], []>} : vector<16x16xf32>, vector<16x32xf32>, vector<16x32xf32> -> vector<16x32xf32>
    %152 = vector.extract_strided_slice %3 {offsets = [32, 0], sizes = [32, 128], strides = [1, 1]} : vector<128x128xf32> to vector<32x128xf32>
    %cst_75 = arith.constant dense<0.000000e+00> : vector<16x128xf32>
    %153 = tpu.matmul %151, %152, %cst_75 {dimension_numbers = #tpu.dot_dimension_numbers<[1], [0], [0], [1], [0, 0, 1, 1], [], []>} : vector<16x32xf32>, vector<32x128xf32>, vector<16x128xf32> -> vector<16x128xf32>
    %154 = arith.addf %135, %153 : vector<16x128xf32>
    %155 = vector.extract_strided_slice %111 {offsets = [0, 64], sizes = [16, 32], strides = [1, 1]} : vector<16x128xf32> to vector<16x32xf32>
    %156 = vector.extract_strided_slice %114 {offsets = [0, 64], sizes = [16, 32], strides = [1, 1]} : vector<16x128xf32> to vector<16x32xf32>
    %157 = vector.extract_strided_slice %117 {offsets = [0, 64], sizes = [16, 32], strides = [1, 1]} : vector<16x128xf32> to vector<16x32xf32>
    %cst_76 = arith.constant dense<0.000000e+00> : vector<16x16xf32>
    %158 = tpu.matmul %155, %156, %cst_76 {dimension_numbers = #tpu.dot_dimension_numbers<[1], [1], [0], [0], [0, 0, 1, 0], [], []>} : vector<16x32xf32>, vector<16x32xf32>, vector<16x16xf32> -> vector<16x16xf32>
    %cst_77 = arith.constant 0.176776692 : f32
    %159 = vector.broadcast %cst_77 : f32 to vector<16x16xf32>
    %160 = arith.mulf %158, %159 : vector<16x16xf32>
    %cst_78 = arith.constant dense<0xFF800000> : vector<16xf32>
    %161 = vector.multi_reduction <maximumf>, %160, %cst_78 [1] : vector<16x16xf32> to vector<16xf32>
    %162 = vector.shape_cast %161 : vector<16xf32> to vector<16x1xf32>
    %163 = vector.broadcast %162 : vector<16x1xf32> to vector<16x16xf32>
    %164 = arith.subf %160, %163 : vector<16x16xf32>
    %165 = math.exp %164 : vector<16x16xf32>
    %cst_79 = arith.constant dense<0.000000e+00> : vector<16xf32>
    %166 = vector.multi_reduction <add>, %165, %cst_79 [1] : vector<16x16xf32> to vector<16xf32>
    %167 = vector.shape_cast %166 : vector<16xf32> to vector<16x1xf32>
    %168 = vector.broadcast %167 : vector<16x1xf32> to vector<16x16xf32>
    %169 = arith.divf %165, %168 : vector<16x16xf32>
    %cst_80 = arith.constant dense<0.000000e+00> : vector<16x32xf32>
    %170 = tpu.matmul %169, %157, %cst_80 {dimension_numbers = #tpu.dot_dimension_numbers<[1], [0], [0], [1], [0, 0, 1, 1], [], []>} : vector<16x16xf32>, vector<16x32xf32>, vector<16x32xf32> -> vector<16x32xf32>
    %171 = vector.extract_strided_slice %3 {offsets = [64, 0], sizes = [32, 128], strides = [1, 1]} : vector<128x128xf32> to vector<32x128xf32>
    %cst_81 = arith.constant dense<0.000000e+00> : vector<16x128xf32>
    %172 = tpu.matmul %170, %171, %cst_81 {dimension_numbers = #tpu.dot_dimension_numbers<[1], [0], [0], [1], [0, 0, 1, 1], [], []>} : vector<16x32xf32>, vector<32x128xf32>, vector<16x128xf32> -> vector<16x128xf32>
    %173 = arith.addf %154, %172 : vector<16x128xf32>
    %174 = vector.extract_strided_slice %111 {offsets = [0, 96], sizes = [16, 32], strides = [1, 1]} : vector<16x128xf32> to vector<16x32xf32>
    %175 = vector.extract_strided_slice %114 {offsets = [0, 96], sizes = [16, 32], strides = [1, 1]} : vector<16x128xf32> to vector<16x32xf32>
    %176 = vector.extract_strided_slice %117 {offsets = [0, 96], sizes = [16, 32], strides = [1, 1]} : vector<16x128xf32> to vector<16x32xf32>
    %cst_82 = arith.constant dense<0.000000e+00> : vector<16x16xf32>
    %177 = tpu.matmul %174, %175, %cst_82 {dimension_numbers = #tpu.dot_dimension_numbers<[1], [1], [0], [0], [0, 0, 1, 0], [], []>} : vector<16x32xf32>, vector<16x32xf32>, vector<16x16xf32> -> vector<16x16xf32>
    %cst_83 = arith.constant 0.176776692 : f32
    %178 = vector.broadcast %cst_83 : f32 to vector<16x16xf32>
    %179 = arith.mulf %177, %178 : vector<16x16xf32>
    %cst_84 = arith.constant dense<0xFF800000> : vector<16xf32>
    %180 = vector.multi_reduction <maximumf>, %179, %cst_84 [1] : vector<16x16xf32> to vector<16xf32>
    %181 = vector.shape_cast %180 : vector<16xf32> to vector<16x1xf32>
    %182 = vector.broadcast %181 : vector<16x1xf32> to vector<16x16xf32>
    %183 = arith.subf %179, %182 : vector<16x16xf32>
    %184 = math.exp %183 : vector<16x16xf32>
    %cst_85 = arith.constant dense<0.000000e+00> : vector<16xf32>
    %185 = vector.multi_reduction <add>, %184, %cst_85 [1] : vector<16x16xf32> to vector<16xf32>
    %186 = vector.shape_cast %185 : vector<16xf32> to vector<16x1xf32>
    %187 = vector.broadcast %186 : vector<16x1xf32> to vector<16x16xf32>
    %188 = arith.divf %184, %187 : vector<16x16xf32>
    %cst_86 = arith.constant dense<0.000000e+00> : vector<16x32xf32>
    %189 = tpu.matmul %188, %176, %cst_86 {dimension_numbers = #tpu.dot_dimension_numbers<[1], [0], [0], [1], [0, 0, 1, 1], [], []>} : vector<16x16xf32>, vector<16x32xf32>, vector<16x32xf32> -> vector<16x32xf32>
    %190 = vector.extract_strided_slice %3 {offsets = [96, 0], sizes = [32, 128], strides = [1, 1]} : vector<128x128xf32> to vector<32x128xf32>
    %cst_87 = arith.constant dense<0.000000e+00> : vector<16x128xf32>
    %191 = tpu.matmul %189, %190, %cst_87 {dimension_numbers = #tpu.dot_dimension_numbers<[1], [0], [0], [1], [0, 0, 1, 1], [], []>} : vector<16x32xf32>, vector<32x128xf32>, vector<16x128xf32> -> vector<16x128xf32>
    %192 = arith.addf %173, %191 : vector<16x128xf32>
    %193 = vector.broadcast %7 : vector<1x128xf32> to vector<16x128xf32>
    %194 = arith.addf %192, %193 : vector<16x128xf32>
    %c1_88 = arith.constant 1 : index
    %c0_89 = arith.constant 0 : index
    %c0_90 = arith.constant 0 : index
    %195 = vector.load %arg12[%c1_88, %c0_89, %c0_90] : memref<2x16x128xf32, #tpu.memory_space<vmem>>, vector<1x16x128xf32>
    %196 = vector.shape_cast %195 : vector<1x16x128xf32> to vector<16x128xf32>
    %197 = vector.shape_cast %194 : vector<16x128xf32> to vector<1x16x128xf32>
    tpu.vector_store %arg12[%c1_88, %c0_89, %c0_90], %197 {strides = array<i32>} : memref<2x16x128xf32, #tpu.memory_space<vmem>>, vector<1x16x128xf32>,
    return
  }
  func.func @transform_0(%arg0: i32) -> (i32, i32, i32) {
    %c0_i32 = arith.constant 0 : i32
    %c0_i32_0 = arith.constant 0 : i32
    %c0_i32_1 = arith.constant 0 : i32
    return %arg0, %c0_i32, %c0_i32_0 : i32, i32, i32
  }
  func.func @transform_1(%arg0: i32) -> (i32, i32, i32) {
    %c0_i32 = arith.constant 0 : i32
    %c0_i32_0 = arith.constant 0 : i32
    %c0_i32_1 = arith.constant 0 : i32
    return %arg0, %c0_i32, %c0_i32_0 : i32, i32, i32
  }
  func.func @transform_2(%arg0: i32) -> (i32, i32, i32) {
    %c0_i32 = arith.constant 0 : i32
    %c0_i32_0 = arith.constant 0 : i32
    %c0_i32_1 = arith.constant 0 : i32
    return %arg0, %c0_i32, %c0_i32_0 : i32, i32, i32
  }
  func.func @transform_3(%arg0: i32) -> (i32, i32) {
    %c0_i32 = arith.constant 0 : i32
    %c0_i32_0 = arith.constant 0 : i32
    %c0_i32_1 = arith.constant 0 : i32
    return %c0_i32, %c0_i32_0 : i32, i32
  }
  func.func @transform_4(%arg0: i32) -> (i32, i32) {
    %c0_i32 = arith.constant 0 : i32
    %c0_i32_0 = arith.constant 0 : i32
    %c0_i32_1 = arith.constant 0 : i32
    return %c0_i32, %c0_i32_0 : i32, i32
  }
  func.func @transform_5(%arg0: i32) -> (i32, i32) {
    %c0_i32 = arith.constant 0 : i32
    %c0_i32_0 = arith.constant 0 : i32
    %c0_i32_1 = arith.constant 0 : i32
    return %c0_i32, %c0_i32_0 : i32, i32
  }
  func.func @transform_6(%arg0: i32) -> (i32, i32) {
    %c0_i32 = arith.constant 0 : i32
    %c0_i32_0 = arith.constant 0 : i32
    %c0_i32_1 = arith.constant 0 : i32
    return %c0_i32, %c0_i32_0 : i32, i32
  }
  func.func @transform_7(%arg0: i32) -> (i32, i32) {
    %c0_i32 = arith.constant 0 : i32
    %c0_i32_0 = arith.constant 0 : i32
    %c0_i32_1 = arith.constant 0 : i32
    return %c0_i32, %c0_i32_0 : i32, i32
  }
  func.func @transform_8(%arg0: i32) -> (i32, i32) {
    %c0_i32 = arith.constant 0 : i32
    %c0_i32_0 = arith.constant 0 : i32
    %c0_i32_1 = arith.constant 0 : i32
    return %c0_i32, %c0_i32_0 : i32, i32
  }
  func.func @transform_9(%arg0: i32) -> (i32, i32) {
    %c0_i32 = arith.constant 0 : i32
    %c0_i32_0 = arith.constant 0 : i32
    %c0_i32_1 = arith.constant 0 : i32
    return %c0_i32, %c0_i32_0 : i32, i32
  }
  func.func @transform_10(%arg0: i32) -> (i32, i32) {
    %c0_i32 = arith.constant 0 : i32
    %c0_i32_0 = arith.constant 0 : i32
    %c0_i32_1 = arith.constant 0 : i32
    return %c0_i32, %c0_i32_0 : i32, i32
  }
  func.func @transform_11(%arg0: i32) -> (i32, i32, i32) {
    %c0_i32 = arith.constant 0 : i32
    %c0_i32_0 = arith.constant 0 : i32
    %c0_i32_1 = arith.constant 0 : i32
    return %arg0, %c0_i32, %c0_i32_0 : i32, i32, i32
  }
}

</mosaic_0001>

<bundles_post_ra>
// kernel: tpu_custom_call.1
= control target key start
LH: loop header
LB: loop body
LE: loop exit
PB: predicated region body
PF: predicated region fallthrough
CT: control target
= control target key end

     0   :  { %16 = vsyncpa [#allocation3], 0  ;;  %s2656_s0 = inlined_call_operand.hbm [shape: f32[2,16,128], index: 0, kind: input, shape index: {}]   ;;  %s2657_s1 = inlined_call_operand.hbm [shape: f32[2,16,128], index: 1, kind: input, shape index: {}]   ;;  %s2658_s2 = inlined_call_operand.hbm [shape: f32[2,16,128], index: 2, kind: input, shape index: {}]   ;;  %s2659_s3 = inlined_call_operand.hbm [shape: f32[128,128], index: 3, kind: input, shape index: {}]   ;;  %s2660_s4 = inlined_call_operand.vmem [shape: f32[1,128], index: 4, kind: input, shape index: {}]   ;;  %s2661_s5 = inlined_call_operand.hbm [shape: f32[128,128], index: 5, kind: input, shape index: {}]   ;;  %s2662_s6 = inlined_call_operand.vmem [shape: f32[1,128], index: 6, kind: input, shape index: {}]   ;;  %s2663_s7 = inlined_call_operand.hbm [shape: f32[128,128], index: 7, kind: input, shape index: {}]   ;;  %s2664_s8 = inlined_call_operand.vmem [shape: f32[1,128], index: 8, kind: input, shape index: {}]   ;;  %s2665_s9 = inlined_call_operand.hbm [shape: f32[128,128], index: 9, kind: input, shape index: {}]   ;;  %s2666_s10 = inlined_call_operand.vmem [shape: f32[1,128], index: 10, kind: input, shape index: {}]   ;;  %s2667_s11 = inlined_call_operand.hbm [shape: f32[2,16,128], index: 11, kind: output, shape index: {}]  }
   0x1   :  { %17 = vsyncpa [#allocation6], 0 }
   0x2   :  { %18 = vsyncpa [#allocation9], 0 }
   0x3   :  { %19 = vsyncpa [#allocation12], 0 }
   0x4   :  { %20 = vsyncpa [#allocation4], 0  ;;  %s38_s19 = sshll.u32 %s2657_s1, 4  ;;  %s2007_s20 = smov [#allocation5]   ;;  %s39_s19 = int_to_ptr.hbm [resolvable:$true] %s38_s19 }
   0x5   :  { %s40_s21 = sshll.u32 %s2007_s20, 4  ;;  %s64_s24 = sshll.u32 %s2659_s3, 4  ;;  %s41_s21 = int_to_ptr.vmem [resolvable:$true] %s40_s21  ;;  %s65_s24 = int_to_ptr.hbm [resolvable:$true] %s64_s24 }
   0x6   :  { %s2008_s25 = smov 128   ;;  %s2009_s26 = smov 8  }
   0x7   :  { %46 = dma.hbm_to_vmem [thread:$0]  %s39_s19, 512, %s41_s21, [#allocation6], %s2008_s25, %s2008_s25, %s2009_s26  }
   0x8   :  { %s2010_s27 = smov [#allocation8]   ;;  %s94_s1 = sshll.u32 %s2663_s7, 4  ;;  %s95_s1 = int_to_ptr.hbm [resolvable:$true] %s94_s1 }
   0x9   :  { %s66_s28 = sshll.u32 %s2010_s27, 4  ;;  %s25_s13 = sshll.u32 %s2656_s0, 4  ;;  %s67_s28 = int_to_ptr.vmem [resolvable:$true] %s66_s28  ;;  %s26_s13 = int_to_ptr.hbm [resolvable:$true] %s25_s13 }
   0xa   :  { %72 = dma.hbm_to_vmem [thread:$0]  %s65_s24, 2048, %s67_s28, [#allocation9], %s2008_s25, %s2008_s25, %s2009_s26  }
   0xb   :  { %s2011_s14 = smov [#allocation11]   ;;  %s2012_s16 = smov [#allocation2]  }
   0xc   :  { %s96_s15 = sshll.u32 %s2011_s14, 4  ;;  %s27_s7 = sshll.u32 %s2012_s16, 4  ;;  %s97_s15 = int_to_ptr.vmem [resolvable:$true] %s96_s15  ;;  %s28_s7 = int_to_ptr.vmem [resolvable:$true] %s27_s7 }
   0xd   :  { %102 = dma.hbm_to_vmem [thread:$0]  %s95_s1, 2048, %s97_s15, [#allocation12], %s2008_s25, %s2008_s25, %s2009_s26  }
   0xe   :  { %s51_s19 = sshll.u32 %s2658_s2, 4  ;;  %s79_s21 = sshll.u32 %s2661_s5, 4  ;;  %s52_s19 = int_to_ptr.hbm [resolvable:$true] %s51_s19  ;;  %s80_s21 = int_to_ptr.hbm [resolvable:$true] %s79_s21 }
   0xf   :  { %33 = dma.hbm_to_vmem [thread:$0]  %s26_s13, 512, %s28_s7, [#allocation3], %s2008_s25, %s2008_s25, %s2009_s26  }
  0x10   :  { %s2013_s22 = smov [#allocation7]   ;;  %s2014_s24 = smov [#allocation10]  }
  0x11   :  { %s53_s23 = sshll.u32 %s2013_s22, 4  ;;  %s81_s2 = sshll.u32 %s2014_s24, 4  ;;  %s54_s23 = int_to_ptr.vmem [resolvable:$true] %s53_s23  ;;  %s82_s2 = int_to_ptr.vmem [resolvable:$true] %s81_s2 }
  0x12   :  { %59 = dma.hbm_to_vmem [thread:$0]  %s52_s19, 512, %s54_s23, [#allocation6], %s2008_s25, %s2008_s25, %s2009_s26  }
  0x13   :  { %s109_s29 = sshll.u32 %s2665_s9, 4  ;;  %s2015_s5 = smov [#allocation13]   ;;  %s110_s29 = int_to_ptr.hbm [resolvable:$true] %s109_s29 }
  0x14   :  { %87 = dma.hbm_to_vmem [thread:$0]  %s80_s21, 2048, %s82_s2, [#allocation9], %s2008_s25, %s2008_s25, %s2009_s26  }
  0x15   :  { %s111_s30 = sshll.u32 %s2015_s5, 4  ;;  %s112_s30 = int_to_ptr.vmem [resolvable:$true] %s111_s30 }
  0x16   :  { %117 = dma.hbm_to_vmem [thread:$0]  %s110_s29, 2048, %s112_s30, [#allocation12], %s2008_s25, %s2008_s25, %s2009_s26  }
  0x17   :  { %1997 = dma.done.wait [#allocation3], 512  }
  0x18   :  { %1998 = vsyncadd [#allocation3], 4294966784 }
  0x19   :  { %1999 = dma.done.wait [#allocation6], 1024  }
  0x1a   :  { %2000 = vsyncadd [#allocation6], 4294966272 }
  0x1b   :  { %2001 = dma.done.wait [#allocation9], 4096  }
  0x1c   :  { %2002 = vsyncadd [#allocation9], 4294963200 }
  0x1d   :  { %2003 = dma.done.wait [#allocation12], 4096  }
  0x1e   :  { %2004 = vsyncadd [#allocation12], 4294963200  ;;  %v2122_v0 = vld [vmem:[#allocation10 + $0x78] sm:$0xff]  ;;  %v2124_v1 = vld [vmem:[#allocation10 + $0x70] sm:$0xff]  ;;  %vm300_vm0 = vcmask 261120   ;;  %s2016_s13 = smov 96  }
  0x1f   :  { %251 = vmatpush.msra.mxu1 %v2122_v0  ;;  %v2127_v2 = vld [vmem:[#allocation10 + $0x68] sm:$0xff]  ;;  %v2129_v3 = vld [vmem:[#allocation8 + $0x78] sm:$0xff]  ;;  %v2133_v4 = vld [vmem:[#allocation8 + $0x70] sm:$0xff]  ;;  %s2018_s15 = smov 32   ;;  %vm338_vm1 = vcmask 130048   ;;  %s1614_s19 = sshll.u32 %s2667_s11, 4  ;;  %s1615_s19 = int_to_ptr.hbm [resolvable:$true] %s1614_s19 }
  0x20   :  { %225 = vmatpush.msra.mxu0 %v2129_v3  ;;  %v2135_v5 = vld [vmem:[#allocation10 + $0x60] sm:$0xff]  ;;  %v2137_v6 = vld [vmem:[#allocation8 + $0x68] sm:$0xff]  ;;  %v2141_v7 = vld [vmem:[#allocation10 + $0x58] sm:$0xff] }
  0x21   :  { %252 = vmatpush.msra.mxu1 %v2124_v1  ;;  %v2143_v8 = vld [vmem:[#allocation8 + $0x60] sm:$0xff]  ;;  %v2147_v9 = vld [vmem:[#allocation10 + $0x50] sm:$0xff]  ;;  %v2149_v10 = vld [vmem:[#allocation8 + $0x58] sm:$0xff] }
  0x22   :  { %226 = vmatpush.msra.mxu0 %v2133_v4  ;;  %v2153_v11 = vld [vmem:[#allocation10 + $0x48] sm:$0xff]  ;;  %v2155_v12 = vld [vmem:[#allocation8 + $0x50] sm:$0xff]  ;;  %v2159_v13 = vld [vmem:[#allocation10 + $0x40] sm:$0xff] }
  0x23   :  { %253 = vmatpush.msra.mxu1 %v2127_v2  ;;  %v2161_v14 = vld [vmem:[#allocation8 + $0x48] sm:$0xff]  ;;  %v2163_v15 = vld [vmem:[#allocation11 + $0x78] sm:$0xff]  ;;  %v2167_v16 = vld [vmem:[#allocation11 + $0x70] sm:$0xff] }
  0x24   :  { %227 = vmatpush.msra.mxu0 %v2137_v6  ;;  %v2169_v17 = vld [vmem:[#allocation10 + $0x38] sm:$0xff]  ;;  %v2171_v18 = vld [vmem:[#allocation8 + $0x40] sm:$0xff]  ;;  %277 = vmatpush.msra.mxu2 %v2163_v15  ;;  %v2176_v19 = vld [vmem:[#allocation11 + $0x68] sm:$0xff] }
  0x25   :  { %254 = vmatpush.msra.mxu1 %v2135_v5  ;;  %2687 = vst [vmem:[#allocation20_spill] sm:$0xff] %v2171_v18  ;;  %v2178_v20 = vld [vmem:[#allocation10 + $0x30] sm:$0xff]  ;;  %v2180_v21 = vld [vmem:[#allocation8 + $0x38] sm:$0xff]  ;;  %v2184_v22 = vld [vmem:[#allocation10 + $0x28] sm:$0xff] }
  0x26   :  { %228 = vmatpush.msra.mxu0 %v2143_v8  ;;  %2688 = vst [vmem:[#allocation21_spill] sm:$0xff] %v2180_v21  ;;  %278 = vmatpush.msra.mxu2 %v2167_v16  ;;  %v2187_v23 = vld [vmem:[#allocation8 + $0x30] sm:$0xff]  ;;  %v2189_v24 = vld [vmem:[#allocation11 + $0x60] sm:$0xff]  ;;  %v2194_v25 = vld [vmem:[#allocation11 + $0x58] sm:$0xff] }
  0x27   :  { %255 = vmatpush.msra.mxu1 %v2141_v7  ;;  %2689 = vst [vmem:[#allocation22_spill] sm:$0xff] %v2187_v23  ;;  %v2196_v26 = vld [vmem:[#allocation10 + $0x20] sm:$0xff]  ;;  %v2198_v27 = vld [vmem:[#allocation8 + $0x28] sm:$0xff]  ;;  %v2203_v28 = vld [vmem:[#allocation11 + $0x50] sm:$0xff] }
  0x28   :  { %229 = vmatpush.msra.mxu0 %v2149_v10  ;;  %279 = vmatpush.msra.mxu2 %v2176_v19  ;;  %2690 = vst [vmem:[#allocation23_spill] sm:$0xff] %v2198_v27  ;;  %v2205_v29 = vld [vmem:[#allocation10 + $0x18] sm:$0xff]  ;;  %v2207_v30 = vld [vmem:[#allocation8 + $0x20] sm:$0xff]  ;;  %v2212_v31 = vld [vmem:[#allocation11 + $0x48] sm:$0xff] }
  0x29   :  { %256 = vmatpush.msra.mxu1 %v2147_v9  ;;  %2691 = vst [vmem:[#allocation24_spill] sm:$0xff] %v2207_v30  ;;  %v2214_v32 = vld [vmem:[#allocation10 + $0x10] sm:$0xff]  ;;  %v2216_v33 = vld [vmem:[#allocation8 + $0x18] sm:$0xff]  ;;  %v2221_v34 = vld [vmem:[#allocation11 + $0x40] sm:$0xff] }
  0x2a   :  { %230 = vmatpush.msra.mxu0 %v2155_v12  ;;  %280 = vmatpush.msra.mxu2 %v2189_v24  ;;  %2692 = vst [vmem:[#allocation25_spill] sm:$0xff] %v2216_v33  ;;  %v2223_v35 = vld [vmem:[#allocation10 + $0x8] sm:$0xff]  ;;  %v2225_v36 = vld [vmem:[#allocation8 + $0x10] sm:$0xff]  ;;  %v2230_v37 = vld [vmem:[#allocation11 + $0x38] sm:$0xff] }
  0x2b   :  { %257 = vmatpush.msra.mxu1 %v2153_v11  ;;  %2693 = vst [vmem:[#allocation26_spill] sm:$0xff] %v2225_v36  ;;  %v2232_v38 = vld [vmem:[#allocation10] sm:$0xff]  ;;  %v2234_v39 = vld [vmem:[#allocation8 + $0x8] sm:$0xff]  ;;  %v2239_v41 = vld [vmem:[#allocation11 + $0x30] sm:$0xff] }
  0x2c   :  { %231 = vmatpush.msra.mxu0 %v2161_v14  ;;  %281 = vmatpush.msra.mxu2 %v2194_v25  ;;  %2694 = vst [vmem:[#allocation27_spill] sm:$0xff] %v2234_v39  ;;  %v218_v40 = vld [vmem:[#allocation5] sm:$0xff]  ;;  %v2246_v44 = vld [vmem:[#allocation11 + $0x28] sm:$0xff]  ;;  %v2253_v46 = vld [vmem:[#allocation11 + $0x18] sm:$0xff] }
  0x2d   :  { %258 = vmatpush.msra.mxu1 %v2159_v13  ;;  %v2241_v42 = vld [vmem:[#allocation8] sm:$0xff]  ;;  %v219_v47 = vld [vmem:[#allocation5 + $0x8] sm:$0xff]  ;;  %v2256_v48 = vld [vmem:[#allocation11 + $0x10] sm:$0xff] }
  0x2e   :  { %232 = vmatpush.msra.mxu0 %v2171_v18  ;;  %282 = vmatpush.msra.mxu2 %v2203_v28  ;;  %2695 = vst [vmem:[#allocation28_spill] sm:$0xff] %v2241_v42  ;;  %v216_v43 = vld [vmem:[#allocation2] sm:$0xff]  ;;  %v217_v49 = vld [vmem:[#allocation2 + $0x8] sm:$0xff] }
  0x2f   :  { %259 = vmatpush.msra.mxu1 %v2169_v17  ;;  %v2250_v45 = vld [vmem:[#allocation11 + $0x20] sm:$0xff]  ;;  %v2259_v50 = vld [vmem:[#allocation11 + $0x8] sm:$0xff] }
  0x30   :  { %233 = vmatpush.msra.mxu0 %v2180_v21  ;;  %283 = vmatpush.msra.mxu2 %v2212_v31  ;;  %v2262_v51 = vld [vmem:[#allocation11] sm:$0xff]  ;;  %v221_v53 = vld [vmem:[#allocation7 + $0x8] sm:$0xff] }
  0x31   :  { %260 = vmatpush.msra.mxu1 %v2178_v20  ;;  %v220_v52 = vld [vmem:[#allocation7] sm:$0xff] }
  0x32   :  { %234 = vmatpush.msra.mxu0 %v2187_v23  ;;  %284 = vmatpush.msra.mxu2 %v2221_v34  ;;  %v2269_v55 = vld [vmem:[%s2662_s6] ss:$0 sm:$0xff] }
  0x33   :  { %261 = vmatpush.msra.mxu1 %v2184_v22  ;;  %2696 = vst [vmem:[#allocation29_spill] sm:$0xff] %v2269_v55  ;;  %v2275_v59 = vld [vmem:[%s2660_s4] ss:$0 sm:$0xff]  ;;  %s2017_s4 = smov 64  }
  0x34   :  { %235 = vmatpush.msra.mxu0 %v2198_v27  ;;  %285 = vmatpush.msra.mxu2 %v2230_v37  ;;  %2697 = vst [vmem:[#allocation30_spill] sm:$0xff] %v2275_v59 }
  0x35   :  { %262 = vmatpush.msra.mxu1 %v2196_v26 }
  0x36   :  { %236 = vmatpush.msra.mxu0 %v2207_v30  ;;  %286 = vmatpush.msra.mxu2 %v2239_v41 }
  0x37   :  { %263 = vmatpush.msra.mxu1 %v2205_v29 }
  0x38   :  { %237 = vmatpush.msra.mxu0 %v2216_v33  ;;  %287 = vmatpush.msra.mxu2 %v2246_v44 }
  0x39   :  { %264 = vmatpush.msra.mxu1 %v2214_v32 }
  0x3a   :  { %238 = vmatpush.msra.mxu0 %v2225_v36  ;;  %288 = vmatpush.msra.mxu2 %v2250_v45 }
  0x3b   :  { %265 = vmatpush.msra.mxu1 %v2223_v35 }
  0x3c   :  { %239 = vmatpush.msra.mxu0 %v2234_v39  ;;  %289 = vmatpush.msra.mxu2 %v2253_v46 }
  0x3d   :  { %266 = vmatpush.msra.mxu1 %v2232_v38 }
  0x3e   :  { %267 = vmatmul.f32.vlgmr.msra.gmra.mxu1 %v218_v40  ;;  %240 = vmatpush.msra.mxu0 %v2241_v42 }
  0x3f   :  { %241 = vmatmul.f32.vlgmr.msra.gmra.mxu0 %v216_v43  ;;  %290 = vmatpush.msra.mxu2 %v2256_v48  ;;  %v2294_v43 = vld [vmem:[%s2664_s8] ss:$0 sm:$0xff] }
  0x40   :  { %2698 = vst [vmem:[#allocation31_spill] sm:$0xff] %v2294_v43 }
  0x41   :  { %291 = vmatpush.msra.mxu2 %v2259_v50 }
  0x43   :  { %292 = vmatpush.msra.mxu2 %v2262_v51 }
  0x44   :  { %293 = vmatmul.f32.vlgmr.msra.gmra.mxu2 %v220_v52 }
  0x46   :  { %270 = vmatmul.f32.gmra.mxu1 %v219_v47 }
  0x47   :  { %244 = vmatmul.f32.gmra.mxu0 %v217_v49 }
  0x4c   :  { %296 = vmatmul.f32.gmra.mxu2 %v221_v53 }
  0xbb   :  { %v268_v54 = vpop.f32.mrf.mxu1 }
  0xbc   :  { %v242_v58 = vpop.f32.mrf.mxu0  ;;  %v2280_v60 = vadd.f32 %v2269_v55, %v268_v54  ;;  %v2309_v54 = vld [vmem:[#allocation13 + $0x18] sm:$0xff] }
  0xbd   :  { %v243_v61 = vadd.f32 %v2275_v59, %v242_v58  ;;  %2699 = vst [vmem:[#allocation32_spill] sm:$0xff] %v2309_v54  ;;  %589 = vmatpush.msrb.mxu2 %v2309_v54  ;;  %v2315_v58 = vld [vmem:[#allocation13 + $0x8] sm:$0xff] }
  0xbe   :  { %2701 = vst [vmem:[#allocation34_spill] sm:$0xff] %v2315_v58 }
  0xc3   :  { %v271_v56 = vpop.f32.mrf.mxu1 }
  0xc4   :  { %v272_v57 = vadd.f32 %v2269_v55, %v271_v56  ;;  %v245_v62 = vpop.f32.mrf.mxu0  ;;  %v2311_v56 = vld [vmem:[#allocation13 + $0x10] sm:$0xff] }
  0xc5   :  { %v246_v63 = vadd.f32 %v2275_v59, %v245_v62  ;;  %2700 = vst [vmem:[#allocation33_spill] sm:$0xff] %v2311_v56  ;;  %590 = vmatpush.msrb.mxu2 %v2311_v56  ;;  %v2318_v62 = vld [vmem:[#allocation13] sm:$0xff] }
  0xc6   :  { %422 = vrot.lane.b32.xlu2 %v272_v57, %s2016_s13  ;;  %1630 = vmatpush.xpose.msk.msra.mxu3 %vm300_vm0, %v272_v57  ;;  %2702 = vst [vmem:[#allocation35_spill] sm:$0xff] %v2318_v62 }
  0xc7   :  { %v294_v40 = vpop.f32.mrf.mxu2  ;;  %591 = vmatpush.msrb.mxu2 %v2315_v58 }
  0xc8   :  { %v2299_v49 = vadd.f32 %v2294_v43, %v294_v40 }
  0xc9   :  { %592 = vmatpush.msrb.mxu2 %v2318_v62 }
  0xca   :  { %1631 = vmatpush.xpose.msk.msra.mxu3 %vm300_vm0, %v2280_v60 }
  0xcd   :  { %1632 = vmatmul.msk.f32.vlgmr.msra.gmra.mxu3 %vm300_vm0, %v243_v61 }
  0xce   :  { %420 = vrot.lane.b32.xlu2 %v2280_v60, %s2016_s13 }
  0xcf   :  { %v297_v47 = vpop.f32.mrf.mxu2 }
  0xd0   :  { %v2302_v52 = vadd.f32 %v2294_v43, %v297_v47 }
  0xd2   :  { %407 = vmatpush.msrb.mxu3 %v2302_v52 }
  0xd4   :  { %408 = vmatpush.msrb.mxu3 %v2299_v49 }
  0xd5   :  { %1633 = vmatmul.msk.f32.gmra.mxu3 %vm300_vm0, %v246_v63 }
  0xd6   :  { %606 = vrot.lane.b32.xlu2 %v272_v57, %s2017_s4 }
  0xde   :  { %604 = vrot.lane.b32.xlu2 %v2280_v60, %s2017_s4 }
  0xe6   :  { %600 = vrot.lane.b32.xlu2 %v243_v61, %s2017_s4 }
  0xee   :  { %761 = vrot.lane.b32.xlu2 %v272_v57, %s2018_s15 }
  0xf6   :  { %757 = vrot.lane.b32.xlu2 %v246_v63, %s2018_s15 }
 0x120   :  { %v423_v53 = vpop.permute.xlu2 %422 }
 0x121   :  { %1636 = vmatpush.xpose.msk.msra.mxu3 %vm300_vm0, %v423_v53 }
 0x128   :  { %v421_v57 = vpop.permute.xlu2 %420 }
 0x129   :  { %1637 = vmatpush.xpose.msk.msra.mxu3 %vm300_vm0, %v421_v57 }
 0x130   :  { %v607_v40 = vpop.permute.xlu2 %606 }
 0x138   :  { %v2323_v47 = vpop.permute.xlu2 %604 }
 0x140   :  { %v2325_v43 = vpop.permute.xlu2 %600 }
 0x148   :  { %v762_v53 = vpop.permute.xlu2 %761 }
 0x149   :  { %1654 = vmatpush.xpose.msk.msra.mxu2 %vm300_vm0, %v762_v53 }
 0x150   :  { %v330_v54 = vpop.f32.mrf.mxu3 }
 0x151   :  { %v336_v56 = vmul.f32 0.17677669, %v330_v54 }
 0x153   :  { %v339_v59 = vsel %vm338_vm1, %v336_v56, -inf }
 0x154   :  { %340 = vmax.xlane.f32.xlu0 %v339_v59 }
 0x158   :  { %v333_v58 = vpop.f32.mrf.mxu3 }
 0x159   :  { %v337_v55 = vmul.f32 0.17677669, %v333_v58 }
 0x15b   :  { %v342_v62 = vsel %vm338_vm1, %v337_v55, -inf }
 0x15c   :  { %343 = vmax.xlane.f32.xlu0 %v342_v62 }
 0x170   :  { %416 = vrot.lane.b32.xlu0 %v243_v61, %s2016_s13 }
 0x178   :  { %602 = vrot.lane.b32.xlu0 %v246_v63, %s2017_s4 }
 0x180   :  { %755 = vrot.lane.b32.xlu0 %v243_v61, %s2018_s15 }
 0x1c7   :  { %v341_v57 = vpop.xlane.xlu0 %340 }
 0x1c8   :  { %v345_v42 = vsub.f32 %v336_v56, %v341_v57 }
 0x1ca   :  { %v347_v53 = vmul.f32 1.442695, %v345_v42 }
 0x1cc   :  { %1741 = vpow2.f32 %v347_v53 }
 0x1cf   :  { %v344_v39 = vpop.xlane.xlu0 %343 }
 0x1d0   :  { %v346_v54 = vsub.f32 %v337_v55, %v344_v39 }
 0x1d2   :  { %v1742_v36 = vpop.eup %1741  ;;  %v349_v33 = vmul.f32 1.442695, %v346_v54 }
 0x1d3   :  { %v351_v59 = vsel %vm338_vm1, %v1742_v36, 0.0 }
 0x1d4   :  { %1743 = vpow2.f32 %v349_v33  ;;  %352 = vadd.xlane.f32.xlu1 %v351_v59 }
 0x1da   :  { %v1744_v58 = vpop.eup %1743 }
 0x1db   :  { %v354_v62 = vsel %vm338_vm1, %v1744_v58, 0.0 }
 0x1dc   :  { %355 = vadd.xlane.f32.xlu1 %v354_v62 }
 0x1f5   :  { %418 = vrot.lane.b32.xlu1 %v246_v63, %s2016_s13 }
 0x1fd   :  { %759 = vrot.lane.b32.xlu1 %v2280_v60, %s2018_s15 }
 0x247   :  { %v353_v61 = vpop.xlane.xlu1 %352 }
 0x248   :  { %1745 = vrcp.f32 %v353_v61  ;;  %v368_v57 = vand.u32 2147483648, %v353_v61  ;;  %v366_v33 = vand.u32 2147483647, %v353_v61  ;;  %vm362_vm3 = vweird.f32 %v353_v61 }
 0x24a   :  { %v369_v62 = vor.u32 1.1754944e-38, %v368_v57  ;;  %vm367_vm5 = vcmp.eq.f32.partialorder %v366_v33, 8.507059e+37 }
 0x24e   :  { %v1746_v42 = vpop.eup %1745 }
 0x24f   :  { %v358_v56 = vmul.f32 %v1746_v42, %v353_v61  ;;  %v356_v39 = vpop.xlane.xlu1 %355  ;;  %vm363_vm2 = vweird.f32 %v1746_v42 }
 0x250   :  { %1747 = vrcp.f32 %v356_v39  ;;  %vm364_vm4 = vmor %vm362_vm3, %vm363_vm2  ;;  %v383_v21 = vand.u32 2147483648, %v356_v39  ;;  %vm377_vm7 = vweird.f32 %v356_v39 }
 0x251   :  { %v359_v55 = vsub.f32 1.0, %v358_v56  ;;  %v381_v56 = vand.u32 2147483647, %v356_v39 }
 0x252   :  { %v384_v61 = vor.u32 1.1754944e-38, %v383_v21 }
 0x253   :  { %v360_v53 = vmul.f32 %v1746_v42, %v359_v55  ;;  %vm382_vm9 = vcmp.eq.f32.partialorder %v381_v56, 8.507059e+37 }
 0x255   :  { %v361_v54 = vadd.f32 %v1746_v42, %v360_v53 }
 0x256   :  { %v1748_v59 = vpop.eup %1747 }
 0x257   :  { %v373_v63 = vmul.f32 %v1748_v59, %v356_v39  ;;  %v365_v30 = vsel %vm364_vm4, %v1746_v42, %v361_v54  ;;  %vm378_vm6 = vweird.f32 %v1748_v59 }
 0x258   :  { %v370_v60 = vsel %vm367_vm5, %v369_v62, %v365_v30  ;;  %vm379_vm8 = vmor %vm377_vm7, %vm378_vm6 }
 0x259   :  { %v374_v27 = vsub.f32 1.0, %v373_v63  ;;  %v371_v23 = vmul.f32 %v1742_v36, %v370_v60  ;;  %v417_v36 = vpop.permute.xlu0 %416 }
 0x25b   :  { %v375_v18 = vmul.f32 %v1748_v59, %v374_v27  ;;  %1634 = vmatmul.msk.f32.vlgmr.msrb.gmra.mxu3 %vm338_vm1, %v371_v23 }
 0x25c   :  { %1646 = vmatpush.xpose.msk.msrb.mxu3 %vm300_vm0, %v607_v40 }
 0x25d   :  { %v376_v55 = vadd.f32 %v1748_v59, %v375_v18 }
 0x25f   :  { %v380_v53 = vsel %vm379_vm8, %v1748_v59, %v376_v55 }
 0x260   :  { %1647 = vmatpush.xpose.msk.msrb.mxu3 %vm300_vm0, %v2323_v47  ;;  %v385_v30 = vsel %vm382_vm9, %v384_v61, %v380_v53 }
 0x261   :  { %v386_v42 = vmul.f32 %v1744_v58, %v385_v30  ;;  %v603_v18 = vpop.permute.xlu0 %602 }
 0x263   :  { %1635 = vmatmul.msk.f32.gmra.mxu3 %vm338_vm1, %v386_v42 }
 0x267   :  { %v419_v27 = vpop.permute.xlu1 %418 }
 0x26b   :  { %1638 = vmatmul.msk.f32.vlgmr.msra.gmra.mxu3 %vm300_vm0, %v417_v36  ;;  %v1707_v36 = vpack.i.bf16 %v2299_v49, %v2302_v52 }
 0x26f   :  { %v760_v23 = vpop.permute.xlu1 %759 }
 0x270   :  { %1655 = vmatpush.xpose.msk.msra.mxu2 %vm300_vm0, %v760_v23 }
 0x273   :  { %1639 = vmatmul.msk.f32.gmra.mxu3 %vm300_vm0, %v419_v27 }
 0x27b   :  { %1648 = vmatmul.msk.f32.vlgmr.msrb.gmra.mxu3 %vm300_vm0, %v2325_v43  ;;  %v756_v43 = vpop.permute.xlu0 %755 }
 0x283   :  { %1649 = vmatmul.msk.f32.gmra.mxu3 %vm300_vm0, %v603_v18 }
 0x2de   :  { %v410_v21 = vpop.f32.mrf.mxu3 }
 0x2df   :  { %1644 = vmatmul.msk.f32.vlgmr.msrb.gmra.mxu2 %vm300_vm0, %v410_v21 }
 0x2e0   :  { %949 = vmatpush.msrb.mxu2 %v2122_v0 }
 0x2e2   :  { %950 = vmatpush.msrb.mxu2 %v2124_v1 }
 0x2e4   :  { %951 = vmatpush.msrb.mxu2 %v2127_v2  ;;  %v758_v2 = vpop.permute.xlu2 %757 }
 0x2e6   :  { %v413_v40 = vpop.f32.mrf.mxu3  ;;  %952 = vmatpush.msrb.mxu2 %v2135_v5 }
 0x2e7   :  { %1645 = vmatmul.msk.f32.gmra.mxu2 %vm300_vm0, %v413_v40 }
 0x2e8   :  { %953 = vmatpush.msrb.mxu2 %v2141_v7 }
 0x2ea   :  { %954 = vmatpush.msrb.mxu2 %v2147_v9 }
 0x2ec   :  { %955 = vmatpush.msrb.mxu2 %v2153_v11 }
 0x2ee   :  { %v449_v47 = vpop.f32.mrf.mxu3  ;;  %956 = vmatpush.msrb.mxu2 %v2159_v13 }
 0x2ef   :  { %v455_v0 = vmul.f32 0.17677669, %v449_v47  ;;  %1656 = vmatmul.msk.f32.vlgmr.msra.gmra.mxu2 %vm300_vm0, %v756_v43 }
 0x2f0   :  { %957 = vmatpush.msrb.mxu2 %v2169_v17 }
 0x2f1   :  { %v457_v1 = vsel %vm338_vm1, %v455_v0, -inf }
 0x2f2   :  { %458 = vmax.xlane.f32.xlu1 %v457_v1  ;;  %958 = vmatpush.msrb.mxu2 %v2178_v20 }
 0x2f4   :  { %959 = vmatpush.msrb.mxu2 %v2184_v22 }
 0x2f6   :  { %v452_v5 = vpop.f32.mrf.mxu3  ;;  %960 = vmatpush.msrb.mxu2 %v2196_v26 }
 0x2f7   :  { %v456_v7 = vmul.f32 0.17677669, %v452_v5  ;;  %1657 = vmatmul.msk.f32.gmra.mxu2 %vm300_vm0, %v758_v2 }
 0x2f8   :  { %961 = vmatpush.msrb.mxu2 %v2205_v29 }
 0x2f9   :  { %v460_v9 = vsel %vm338_vm1, %v456_v7, -inf }
 0x2fa   :  { %461 = vmax.xlane.f32.xlu0 %v460_v9  ;;  %962 = vmatpush.msrb.mxu2 %v2214_v32 }
 0x2fc   :  { %963 = vmatpush.msrb.mxu2 %v2223_v35 }
 0x2fe   :  { %v633_v11 = vpop.f32.mrf.mxu3  ;;  %964 = vmatpush.msrb.mxu2 %v2232_v38 }
 0x2ff   :  { %v639_v13 = vmul.f32 0.17677669, %v633_v11 }
 0x301   :  { %v641_v17 = vsel %vm338_vm1, %v639_v13, -inf }
 0x302   :  { %642 = vmax.xlane.f32.xlu2 %v641_v17 }
 0x306   :  { %v636_v20 = vpop.f32.mrf.mxu3 }
 0x307   :  { %v640_v22 = vmul.f32 0.17677669, %v636_v20 }
 0x309   :  { %v644_v26 = vsel %vm338_vm1, %v640_v22, -inf }
 0x30a   :  { %645 = vmax.xlane.f32.xlu1 %v644_v26 }
 0x362   :  { %v2377_v54 = vpop.f32.mrf.mxu2 }
 0x365   :  { %v459_v29 = vpop.xlane.xlu1 %458 }
 0x366   :  { %v463_v58 = vsub.f32 %v455_v0, %v459_v29 }
 0x368   :  { %v465_v39 = vmul.f32 1.442695, %v463_v58 }
 0x36a   :  { %1749 = vpow2.f32 %v465_v39  ;;  %v2383_v61 = vpop.f32.mrf.mxu2 }
 0x36d   :  { %v462_v57 = vpop.xlane.xlu0 %461 }
 0x36e   :  { %v464_v32 = vsub.f32 %v456_v7, %v462_v57 }
 0x370   :  { %v2373_v33 = vpop.eup %1749  ;;  %v467_v35 = vmul.f32 1.442695, %v464_v32 }
 0x371   :  { %v469_v38 = vsel %vm338_vm1, %v2373_v33, 0.0 }
 0x372   :  { %1751 = vpow2.f32 %v467_v35  ;;  %470 = vadd.xlane.f32.xlu0 %v469_v38  ;;  %v788_v18 = vpop.f32.mrf.mxu2 }
 0x373   :  { %v2396_v40 = vmul.f32 0.17677669, %v788_v18 }
 0x375   :  { %v643_v59 = vpop.xlane.xlu2 %642  ;;  %v796_v43 = vsel %vm338_vm1, %v2396_v40, -inf }
 0x376   :  { %v647_v62 = vsub.f32 %v639_v13, %v643_v59 }
 0x378   :  { %v2379_v63 = vpop.eup %1751  ;;  %v649_v60 = vmul.f32 1.442695, %v647_v62 }
 0x379   :  { %v472_v56 = vsel %vm338_vm1, %v2379_v63, 0.0 }
 0x37a   :  { %1753 = vpow2.f32 %v649_v60  ;;  %473 = vadd.xlane.f32.xlu2 %v472_v56  ;;  %v791_v47 = vpop.f32.mrf.mxu2  ;;  %v2406_v56 = vld [vmem:[#allocation13 + $0x38] sm:$0xff] }
 0x37b   :  { %v2400_v0 = vmul.f32 0.17677669, %v791_v47  ;;  %560 = vmatpush.msrb.mxu1 %v2406_v56 }
 0x37d   :  { %v646_v55 = vpop.xlane.xlu1 %645  ;;  %v799_v49 = vsel %vm338_vm1, %v2400_v0, -inf }
 0x37e   :  { %v648_v53 = vsub.f32 %v640_v22, %v646_v55  ;;  %v2408_v55 = vld [vmem:[#allocation13 + $0x30] sm:$0xff] }
 0x37f   :  { %561 = vmatpush.msrb.mxu1 %v2408_v55 }
 0x380   :  { %v2385_v30 = vpop.eup %1753  ;;  %v651_v42 = vmul.f32 1.442695, %v648_v53 }
 0x381   :  { %v653_v27 = vsel %vm338_vm1, %v2385_v30, 0.0 }
 0x382   :  { %1755 = vpow2.f32 %v651_v42  ;;  %654 = vadd.xlane.f32.xlu1 %v653_v27 }
 0x386   :  { %1708 = vrot.lane.b32.xlu0 %v1707_v36, %s2016_s13 }
 0x388   :  { %v2392_v23 = vpop.eup %1755 }
 0x389   :  { %v656_v21 = vsel %vm338_vm1, %v2392_v23, 0.0 }
 0x38a   :  { %657 = vadd.xlane.f32.xlu2 %v656_v21  ;;  %v2413_v21 = vld [vmem:[#allocation13 + $0x28] sm:$0xff] }
 0x38b   :  { %562 = vmatpush.msrb.mxu1 %v2413_v21 }
 0x392   :  { %797 = vmax.xlane.f32.xlu2 %v796_v43 }
 0x39a   :  { %800 = vmax.xlane.f32.xlu2 %v799_v49 }
 0x39b   :  { %1713 = vrot.lane.b32.xlu1 %v1707_v36, %s2017_s4 }
 0x3a3   :  { %1718 = vrot.lane.b32.xlu1 %v1707_v36, %s2018_s15 }
 0x3e5   :  { %v471_v52 = vpop.xlane.xlu0 %470 }
 0x3e6   :  { %1757 = vrcp.f32 %v471_v52  ;;  %v486_v13 = vand.u32 2147483648, %v471_v52  ;;  %vm480_vm11 = vweird.f32 %v471_v52  ;;  %v484_v20 = vand.u32 2147483647, %v471_v52 }
 0x3e8   :  { %v487_v58 = vor.u32 1.1754944e-38, %v486_v13  ;;  %vm485_vm13 = vcmp.eq.f32.partialorder %v484_v20, 8.507059e+37 }
 0x3ec   :  { %v1758_v1 = vpop.eup %1757 }
 0x3ed   :  { %v476_v2 = vmul.f32 %v1758_v1, %v471_v52  ;;  %v474_v5 = vpop.xlane.xlu2 %473  ;;  %vm481_vm10 = vweird.f32 %v1758_v1  ;;  %v2417_v52 = vld [vmem:[#allocation13 + $0x20] sm:$0xff] }
 0x3ee   :  { %1759 = vrcp.f32 %v474_v5  ;;  %vm482_vm12 = vmor %vm480_vm11, %vm481_vm10  ;;  %v501_v59 = vand.u32 2147483648, %v474_v5  ;;  %vm495_vm15 = vweird.f32 %v474_v5  ;;  %v499_v27 = vand.u32 2147483647, %v474_v5  ;;  %563 = vmatpush.msrb.mxu1 %v2417_v52 }
 0x3ef   :  { %v477_v7 = vsub.f32 1.0, %v476_v2 }
 0x3f0   :  { %v502_v47 = vor.u32 1.1754944e-38, %v501_v59  ;;  %vm500_vm3 = vcmp.eq.f32.partialorder %v499_v27, 8.507059e+37 }
 0x3f1   :  { %v478_v9 = vmul.f32 %v1758_v1, %v477_v7 }
 0x3f3   :  { %v479_v11 = vadd.f32 %v1758_v1, %v478_v9 }
 0x3f4   :  { %v1760_v17 = vpop.eup %1759 }
 0x3f5   :  { %v491_v22 = vmul.f32 %v1760_v17, %v474_v5  ;;  %v655_v26 = vpop.xlane.xlu1 %654  ;;  %v483_v29 = vsel %vm482_vm12, %v1758_v1, %v479_v11  ;;  %vm496_vm14 = vweird.f32 %v1760_v17 }
 0x3f6   :  { %1761 = vrcp.f32 %v655_v26  ;;  %v488_v38 = vsel %vm485_vm13, %v487_v58, %v483_v29  ;;  %vm497_vm2 = vmor %vm495_vm15, %vm496_vm14  ;;  %v670_v20 = vand.u32 2147483648, %v655_v26  ;;  %vm664_vm5 = vweird.f32 %v655_v26 }
 0x3f7   :  { %v492_v39 = vsub.f32 1.0, %v491_v22  ;;  %v489_v42 = vmul.f32 %v2373_v33, %v488_v38  ;;  %v668_v29 = vand.u32 2147483647, %v655_v26 }
 0x3f8   :  { %v1709_v57 = vpop.permute.xlu0 %1708 }
 0x3f9   :  { %v493_v32 = vmul.f32 %v1760_v17, %v492_v39  ;;  %v1710_v35 = vunpack.i.l.bf16 %v1709_v57  ;;  %v1711_v62 = vunpack.i.h.bf16 %v1709_v57  ;;  %v671_v57 = vor.u32 1.1754944e-38, %v670_v20 }
 0x3fa   :  { %vm669_vm7 = vcmp.eq.f32.partialorder %v668_v29, 8.507059e+37 }
 0x3fb   :  { %533 = vmatpush.msrb.mxu0 %v1710_v35  ;;  %v494_v60 = vadd.f32 %v1760_v17, %v493_v32 }
 0x3fc   :  { %v1762_v53 = vpop.eup %1761 }
 0x3fd   :  { %v660_v36 = vmul.f32 %v1762_v53, %v655_v26  ;;  %v658_v18 = vpop.xlane.xlu2 %657  ;;  %534 = vmatpush.msrb.mxu0 %v1711_v62  ;;  %v498_v43 = vsel %vm497_vm2, %v1760_v17, %v494_v60  ;;  %vm665_vm4 = vweird.f32 %v1762_v53 }
 0x3fe   :  { %1763 = vrcp.f32 %v658_v18  ;;  %1640 = vmatmul.msk.f32.vlgmr.msrb.gmra.mxu0 %vm338_vm1, %v489_v42  ;;  %v503_v33 = vsel %vm500_vm3, %v502_v47, %v498_v43  ;;  %vm666_vm6 = vmor %vm664_vm5, %vm665_vm4  ;;  %v685_v60 = vand.u32 2147483648, %v658_v18  ;;  %vm679_vm9 = vweird.f32 %v658_v18 }
 0x3ff   :  { %v661_v49 = vsub.f32 1.0, %v660_v36  ;;  %v504_v5 = vmul.f32 %v2379_v63, %v503_v33  ;;  %v683_v36 = vand.u32 2147483647, %v658_v18 }
 0x400   :  { %v686_v43 = vor.u32 1.1754944e-38, %v685_v60 }
 0x401   :  { %v662_v1 = vmul.f32 %v1762_v53, %v661_v49  ;;  %vm684_vm11 = vcmp.eq.f32.partialorder %v683_v36, 8.507059e+37 }
 0x403   :  { %v663_v13 = vadd.f32 %v1762_v53, %v662_v1 }
 0x404   :  { %v1764_v2 = vpop.eup %1763 }
 0x405   :  { %v675_v7 = vmul.f32 %v1764_v2, %v658_v18  ;;  %v798_v9 = vpop.xlane.xlu2 %797  ;;  %v667_v58 = vsel %vm666_vm6, %v1762_v53, %v663_v13  ;;  %vm680_vm8 = vweird.f32 %v1764_v2  ;;  %v2708_v13 = vld [vmem:[#allocation25_spill] sm:$0xff] }
 0x406   :  { %v802_v11 = vsub.f32 %v2396_v40, %v798_v9  ;;  %1641 = vmatmul.msk.f32.gmra.mxu0 %vm338_vm1, %v504_v5  ;;  %v672_v35 = vsel %vm669_vm7, %v671_v57, %v667_v58  ;;  %vm681_vm10 = vmor %vm679_vm9, %vm680_vm8  ;;  %v2709_v58 = vld [vmem:[#allocation26_spill] sm:$0xff] }
 0x407   :  { %v676_v17 = vsub.f32 1.0, %v675_v7  ;;  %v673_v53 = vmul.f32 %v2385_v30, %v672_v35 }
 0x408   :  { %v804_v22 = vmul.f32 1.442695, %v802_v11 }
 0x409   :  { %v677_v39 = vmul.f32 %v1764_v2, %v676_v17 }
 0x40a   :  { %1765 = vpow2.f32 %v804_v22 }
 0x40b   :  { %v678_v59 = vadd.f32 %v1764_v2, %v677_v39 }
 0x40d   :  { %v1714_v63 = vpop.permute.xlu1 %1713  ;;  %v801_v32 = vpop.xlane.xlu2 %800 }
 0x40e   :  { %v1715_v38 = vunpack.i.l.bf16 %v1714_v63  ;;  %v803_v40 = vsub.f32 %v2400_v0, %v801_v32  ;;  %v1716_v42 = vunpack.i.h.bf16 %v1714_v63  ;;  %v682_v0 = vsel %vm681_vm10, %v1764_v2, %v678_v59  ;;  %v2707_v2 = vld [vmem:[#allocation24_spill] sm:$0xff]  ;;  %v2710_v63 = vld [vmem:[#allocation27_spill] sm:$0xff] }
 0x40f   :  { %v687_v33 = vsel %vm684_vm11, %v686_v43, %v682_v0 }
 0x410   :  { %v2425_v62 = vpop.eup %1765  ;;  %v806_v27 = vmul.f32 1.442695, %v803_v40  ;;  %715 = vmatpush.msra.mxu0 %v1715_v38  ;;  %v688_v18 = vmul.f32 %v2392_v23, %v687_v33  ;;  %v2711_v38 = vld [vmem:[#allocation28_spill] sm:$0xff] }
 0x411   :  { %v808_v26 = vsel %vm338_vm1, %v2425_v62, 0.0 }
 0x412   :  { %1767 = vpow2.f32 %v806_v27  ;;  %809 = vadd.xlane.f32.xlu0 %v808_v26  ;;  %716 = vmatpush.msra.mxu0 %v1716_v42  ;;  %v2493_v42 = vld [vmem:[#allocation13 + $0x78] sm:$0xff]  ;;  %v2495_v27 = vld [vmem:[#allocation13 + $0x70] sm:$0xff]  ;;  %v2712_v26 = vld [vmem:[#allocation29_spill] sm:$0xff] }
 0x413   :  { %1650 = vmatmul.msk.f32.vlgmr.msra.gmra.mxu0 %vm338_vm1, %v673_v53 }
 0x414   :  { %897 = vmatpush.msrb.mxu0 %v2493_v42 }
 0x415   :  { %v1719_v47 = vpop.permute.xlu1 %1718 }
 0x416   :  { %v1720_v49 = vunpack.i.l.bf16 %v1719_v47  ;;  %v1721_v5 = vunpack.i.h.bf16 %v1719_v47  ;;  %898 = vmatpush.msrb.mxu0 %v2495_v27 }
 0x418   :  { %v2431_v1 = vpop.eup %1767  ;;  %870 = vmatpush.msra.mxu3 %v1720_v49 }
 0x419   :  { %v811_v30 = vsel %vm338_vm1, %v2431_v1, 0.0 }
 0x41a   :  { %871 = vmatpush.msra.mxu3 %v1721_v5  ;;  %812 = vadd.xlane.f32.xlu2 %v811_v30 }
 0x41b   :  { %1651 = vmatmul.msk.f32.gmra.mxu0 %vm338_vm1, %v688_v18 }
 0x41c   :  { %972 = vmatpush.msrb.mxu3 %v2163_v15  ;;  %v2453_v15 = vld [vmem:[#allocation13 + $0x58] sm:$0xff] }
 0x41d   :  { %742 = vmatpush.msra.mxu1 %v2453_v15 }
 0x41e   :  { %973 = vmatpush.msrb.mxu3 %v2167_v16  ;;  %v2456_v16 = vld [vmem:[#allocation13 + $0x50] sm:$0xff] }
 0x41f   :  { %743 = vmatpush.msra.mxu1 %v2456_v16 }
 0x420   :  { %974 = vmatpush.msrb.mxu3 %v2176_v19  ;;  %v2458_v19 = vld [vmem:[#allocation13 + $0x48] sm:$0xff] }
 0x421   :  { %744 = vmatpush.msra.mxu1 %v2458_v19 }
 0x422   :  { %975 = vmatpush.msrb.mxu3 %v2189_v24  ;;  %v2461_v24 = vld [vmem:[#allocation13 + $0x40] sm:$0xff] }
 0x423   :  { %745 = vmatpush.msra.mxu1 %v2461_v24 }
 0x424   :  { %976 = vmatpush.msrb.mxu3 %v2194_v25  ;;  %v921_v25 = vld [vmem:[#allocation5 + $0x10] sm:$0xff] }
 0x425   :  { %965 = vmatmul.f32.vlgmr.msrb.gmra.mxu2 %v921_v25 }
 0x426   :  { %977 = vmatpush.msrb.mxu3 %v2203_v28  ;;  %v922_v28 = vld [vmem:[#allocation5 + $0x18] sm:$0xff] }
 0x428   :  { %978 = vmatpush.msrb.mxu3 %v2212_v31 }
 0x42a   :  { %979 = vmatpush.msrb.mxu3 %v2221_v34 }
 0x42c   :  { %980 = vmatpush.msrb.mxu3 %v2230_v37 }
 0x42d   :  { %968 = vmatmul.f32.gmra.mxu2 %v922_v28 }
 0x42e   :  { %981 = vmatpush.msrb.mxu3 %v2239_v41  ;;  %v2703_v41 = vld [vmem:[#allocation20_spill] sm:$0xff] }
 0x430   :  { %982 = vmatpush.msrb.mxu3 %v2246_v44 }
 0x432   :  { %983 = vmatpush.msrb.mxu3 %v2250_v45  ;;  %v2704_v45 = vld [vmem:[#allocation21_spill] sm:$0xff] }
 0x434   :  { %984 = vmatpush.msrb.mxu3 %v2253_v46 }
 0x436   :  { %985 = vmatpush.msrb.mxu3 %v2256_v48 }
 0x438   :  { %986 = vmatpush.msrb.mxu3 %v2259_v50 }
 0x43a   :  { %987 = vmatpush.msrb.mxu3 %v2262_v51 }
 0x47b   :  { %v536_v31 = vpop.f32.mrf.mxu0 }
 0x47c   :  { %1642 = vmatmul.msk.f32.vlgmr.msrb.gmra.mxu1 %vm300_vm0, %v536_v31 }
 0x47d   :  { %926 = vmatpush.msrb.mxu1 %v2129_v3 }
 0x47f   :  { %927 = vmatpush.msrb.mxu1 %v2133_v4 }
 0x481   :  { %928 = vmatpush.msrb.mxu1 %v2137_v6 }
 0x483   :  { %v539_v34 = vpop.f32.mrf.mxu0  ;;  %929 = vmatpush.msrb.mxu1 %v2143_v8  ;;  %v2705_v8 = vld [vmem:[#allocation22_spill] sm:$0xff] }
 0x484   :  { %1643 = vmatmul.msk.f32.gmra.mxu1 %vm300_vm0, %v539_v34 }
 0x485   :  { %v810_v37 = vpop.xlane.xlu0 %809  ;;  %930 = vmatpush.msrb.mxu1 %v2149_v10 }
 0x486   :  { %1769 = vrcp.f32 %v810_v37  ;;  %v825_v46 = vand.u32 2147483648, %v810_v37  ;;  %v823_v10 = vand.u32 2147483647, %v810_v37  ;;  %vm819_vm13 = vweird.f32 %v810_v37 }
 0x487   :  { %931 = vmatpush.msrb.mxu1 %v2155_v12  ;;  %v2706_v12 = vld [vmem:[#allocation23_spill] sm:$0xff] }
 0x488   :  { %v826_v23 = vor.u32 1.1754944e-38, %v825_v46  ;;  %vm824_vm15 = vcmp.eq.f32.partialorder %v823_v10, 8.507059e+37 }
 0x489   :  { %932 = vmatpush.msrb.mxu1 %v2161_v14 }
 0x48b   :  { %933 = vmatpush.msrb.mxu1 %v2703_v41 }
 0x48c   :  { %v1770_v3 = vpop.eup %1769 }
 0x48d   :  { %v815_v44 = vmul.f32 %v1770_v3, %v810_v37  ;;  %v813_v4 = vpop.xlane.xlu2 %812  ;;  %934 = vmatpush.msrb.mxu1 %v2704_v45  ;;  %vm820_vm12 = vweird.f32 %v1770_v3  ;;  %v2713_v37 = vld [vmem:[#allocation30_spill] sm:$0xff] }
 0x48e   :  { %1771 = vrcp.f32 %v813_v4  ;;  %vm821_vm14 = vmor %vm819_vm13, %vm820_vm12  ;;  %v840_v22 = vand.u32 2147483648, %v813_v4  ;;  %v838_v57 = vand.u32 2147483647, %v813_v4  ;;  %vm834_vm3 = vweird.f32 %v813_v4 }
 0x48f   :  { %v816_v6 = vsub.f32 1.0, %v815_v44  ;;  %935 = vmatpush.msrb.mxu1 %v2705_v8 }
 0x490   :  { %v718_v48 = vpop.f32.mrf.mxu0  ;;  %v841_v35 = vor.u32 1.1754944e-38, %v840_v22  ;;  %vm839_vm5 = vcmp.eq.f32.partialorder %v838_v57, 8.507059e+37 }
 0x491   :  { %v817_v50 = vmul.f32 %v1770_v3, %v816_v6  ;;  %1652 = vmatmul.msk.f32.vlgmr.msra.gmra.mxu1 %vm300_vm0, %v718_v48 }
 0x492   :  { %936 = vmatpush.msrb.mxu1 %v2706_v12 }
 0x493   :  { %v818_v14 = vadd.f32 %v1770_v3, %v817_v50 }
 0x494   :  { %v1772_v51 = vpop.eup %1771  ;;  %937 = vmatpush.msrb.mxu1 %v2707_v2 }
 0x495   :  { %v822_v7 = vsel %vm821_vm14, %v1770_v3, %v818_v14  ;;  %v830_v9 = vmul.f32 %v1772_v51, %v813_v4  ;;  %vm835_vm2 = vweird.f32 %v1772_v51 }
 0x496   :  { %v827_v11 = vsel %vm824_vm15, %v826_v23, %v822_v7  ;;  %938 = vmatpush.msrb.mxu1 %v2708_v13  ;;  %vm836_vm4 = vmor %vm834_vm3, %vm835_vm2  ;;  %v925_v23 = vld [vmem:[#allocation7 + $0x18] sm:$0xff] }
 0x497   :  { %v831_v17 = vsub.f32 1.0, %v830_v9  ;;  %v828_v20 = vmul.f32 %v2425_v62, %v827_v11  ;;  %v918_v62 = vld [vmem:[#allocation2 + $0x10] sm:$0xff] }
 0x498   :  { %v721_v29 = vpop.f32.mrf.mxu0  ;;  %939 = vmatpush.msrb.mxu1 %v2709_v58 }
 0x499   :  { %v832_v39 = vmul.f32 %v1772_v51, %v831_v17  ;;  %1653 = vmatmul.msk.f32.gmra.mxu1 %vm300_vm0, %v721_v29  ;;  %1658 = vmatmul.msk.f32.vlgmr.msra.gmra.mxu3 %vm338_vm1, %v828_v20  ;;  %v2714_v29 = vld [vmem:[#allocation31_spill] sm:$0xff] }
 0x49a   :  { %940 = vmatpush.msrb.mxu1 %v2710_v63  ;;  %1253 = vmatpush.msra.mxu3 %v2406_v56  ;;  %v919_v56 = vld [vmem:[#allocation2 + $0x18] sm:$0xff]  ;;  %v2715_v63 = vld [vmem:[#allocation32_spill] sm:$0xff] }
 0x49b   :  { %v833_v32 = vadd.f32 %v1772_v51, %v832_v39 }
 0x49c   :  { %941 = vmatpush.msrb.mxu1 %v2711_v38  ;;  %1254 = vmatpush.msra.mxu3 %v2408_v55  ;;  %v2718_v38 = vld [vmem:[#allocation35_spill] sm:$0xff] }
 0x49d   :  { %v837_v40 = vsel %vm836_vm4, %v1772_v51, %v833_v32  ;;  %v924_v51 = vld [vmem:[#allocation7 + $0x10] sm:$0xff]  ;;  %v2716_v32 = vld [vmem:[#allocation33_spill] sm:$0xff] }
 0x49e   :  { %v842_v59 = vsel %vm839_vm5, %v841_v35, %v837_v40  ;;  %1255 = vmatpush.msra.mxu3 %v2413_v21  ;;  %v2504_v21 = vld [vmem:[#allocation13 + $0x68] sm:$0xff]  ;;  %v2717_v35 = vld [vmem:[#allocation34_spill] sm:$0xff] }
 0x49f   :  { %v843_v60 = vmul.f32 %v2431_v1, %v842_v59  ;;  %899 = vmatpush.msrb.mxu0 %v2504_v21 }
 0x4a0   :  { %1256 = vmatpush.msra.mxu3 %v2417_v52  ;;  %v2506_v52 = vld [vmem:[#allocation13 + $0x60] sm:$0xff] }
 0x4a1   :  { %1659 = vmatmul.msk.f32.gmra.mxu3 %vm338_vm1, %v843_v60  ;;  %942 = vmatmul.f32.vlgmr.msrb.gmra.mxu1 %v918_v62 }
 0x4a2   :  { %900 = vmatpush.msrb.mxu0 %v2506_v52 }
 0x4a8   :  { %v966_v55 = vpop.f32.mrf.mxu2 }
 0x4a9   :  { %945 = vmatmul.f32.gmra.mxu1 %v919_v56  ;;  %v2499_v53 = vadd.f32 %v2712_v26, %v966_v55  ;;  %988 = vmatmul.f32.vlgmr.msrb.gmra.mxu3 %v924_v51 }
 0x4aa   :  { %1435 = vmatpush.msrb.mxu3 %v2453_v15 }
 0x4ab   :  { %1113 = vrot.lane.b32.xlu0 %v2499_v53, %s2016_s13 }
 0x4ac   :  { %1436 = vmatpush.msrb.mxu3 %v2456_v16 }
 0x4ae   :  { %1437 = vmatpush.msrb.mxu3 %v2458_v19 }
 0x4b0   :  { %v969_v36 = vpop.f32.mrf.mxu2  ;;  %1438 = vmatpush.msrb.mxu3 %v2461_v24 }
 0x4b1   :  { %v2510_v0 = vadd.f32 %v2712_v26, %v969_v36  ;;  %991 = vmatmul.f32.gmra.mxu3 %v925_v23 }
 0x4b3   :  { %1662 = vmatpush.xpose.msk.msra.mxu0 %vm300_vm0, %v2510_v0 }
 0x4b7   :  { %1663 = vmatpush.xpose.msk.msra.mxu0 %vm300_vm0, %v2499_v53 }
 0x4f9   :  { %v565_v43 = vpop.f32.mrf.mxu1 }
 0x4fa   :  { %v595_v49 = vadd.f32 %v2377_v54, %v565_v43  ;;  %v2534_v54 = vld [vmem:[%s2666_s10] ss:$0 sm:$0xff]  ;;  %s2019_s10 = smov [#allocation14]  }
 0x4fb   :  { %s1612_s7 = sshll.u32 %s2019_s10, 4  ;;  %s1613_s7 = int_to_ptr.vmem [resolvable:$true] %s1612_s7 }
 0x501   :  { %v568_v47 = vpop.f32.mrf.mxu1 }
 0x502   :  { %v598_v5 = vadd.f32 %v2383_v61, %v568_v47 }
 0x50e   :  { %v747_v33 = vpop.f32.mrf.mxu1 }
 0x50f   :  { %v753_v1 = vadd.f32 %v747_v33, %v595_v49 }
 0x516   :  { %v750_v30 = vpop.f32.mrf.mxu1 }
 0x517   :  { %v754_v18 = vadd.f32 %v750_v30, %v598_v5 }
 0x51c   :  { %v873_v25 = vpop.f32.mrf.mxu3 }
 0x51d   :  { %1660 = vmatmul.msk.f32.vlgmr.msrb.gmra.mxu0 %vm300_vm0, %v873_v25  ;;  %v1114_v40 = vpop.permute.xlu0 %1113 }
 0x51e   :  { %v943_v28 = vpop.f32.mrf.mxu1 }
 0x51f   :  { %v944_v3 = vadd.f32 %v2713_v37, %v943_v28 }
 0x524   :  { %v876_v31 = vpop.f32.mrf.mxu3 }
 0x525   :  { %1661 = vmatmul.msk.f32.gmra.mxu0 %vm300_vm0, %v876_v31 }
 0x526   :  { %v946_v34 = vpop.f32.mrf.mxu1 }
 0x527   :  { %v947_v41 = vadd.f32 %v2713_v37, %v946_v34 }
 0x529   :  { %1111 = vrot.lane.b32.xlu0 %v947_v41, %s2016_s13 }
 0x52c   :  { %v989_v20 = vpop.f32.mrf.mxu3 }
 0x52d   :  { %1664 = vmatmul.msk.f32.vlgmr.msra.gmra.mxu0 %vm300_vm0, %v944_v3  ;;  %v990_v58 = vadd.f32 %v2714_v29, %v989_v20 }
 0x531   :  { %1297 = vrot.lane.b32.xlu0 %v2499_v53, %s2017_s4 }
 0x534   :  { %v992_v22 = vpop.f32.mrf.mxu3 }
 0x535   :  { %1665 = vmatmul.msk.f32.gmra.mxu0 %vm300_vm0, %v947_v41  ;;  %v993_v39 = vadd.f32 %v2714_v29, %v992_v22 }
 0x537   :  { %1100 = vmatpush.msrb.mxu0 %v993_v39  ;;  %v2561_v57 = vpack.i.bf16 %v990_v58, %v993_v39 }
 0x539   :  { %1454 = vrot.lane.b32.xlu0 %v2510_v0, %s2018_s15  ;;  %1101 = vmatpush.msrb.mxu0 %v990_v58 }
 0x53b   :  { %1282 = vmatpush.msra.mxu0 %v2715_v63 }
 0x53d   :  { %1283 = vmatpush.msra.mxu0 %v2716_v32 }
 0x53f   :  { %1284 = vmatpush.msra.mxu0 %v2717_v35 }
 0x541   :  { %1448 = vrot.lane.b32.xlu0 %v944_v3, %s2018_s15  ;;  %1285 = vmatpush.msra.mxu0 %v2718_v38 }
 0x59a   :  { %v902_v61 = vpop.f32.mrf.mxu0 }
 0x59b   :  { %v908_v44 = vadd.f32 %v902_v61, %v753_v1  ;;  %v1112_v59 = vpop.permute.xlu0 %1111 }
 0x59d   :  { %v913_v4 = vadd.f32 %v2534_v54, %v908_v44 }
 0x59f   :  { %915 = vst [vmem:[#allocation14] sm:$0xff] %v913_v4 }
 0x5a2   :  { %v905_v45 = vpop.f32.mrf.mxu0 }
 0x5a3   :  { %v909_v6 = vadd.f32 %v905_v45, %v754_v18  ;;  %v1298_v26 = vpop.permute.xlu0 %1297 }
 0x5a5   :  { %v914_v8 = vadd.f32 %v2534_v54, %v909_v6 }
 0x5a7   :  { %916 = vst [vmem:[#allocation14 + $0x8] sm:$0xff] %v914_v8 }
 0x5aa   :  { %v1024_v46 = vpop.f32.mrf.mxu0 }
 0x5ab   :  { %v1030_v48 = vmul.f32 0.17677669, %v1024_v46  ;;  %v1455_v34 = vpop.permute.xlu0 %1454 }
 0x5ad   :  { %v1032_v50 = vsel %vm338_vm1, %v1030_v48, -inf }
 0x5ae   :  { %1033 = vmax.xlane.f32.xlu2 %v1032_v50 }
 0x5b2   :  { %v1027_v10 = vpop.f32.mrf.mxu0 }
 0x5b3   :  { %v1031_v12 = vmul.f32 0.17677669, %v1027_v10 }
 0x5b5   :  { %v1035_v14 = vsel %vm338_vm1, %v1031_v12, -inf }
 0x5b6   :  { %1036 = vmax.xlane.f32.xlu1 %v1035_v14 }
 0x5cf   :  { %1109 = vrot.lane.b32.xlu1 %v944_v3, %s2016_s13 }
 0x5d7   :  { %1295 = vrot.lane.b32.xlu1 %v947_v41, %s2017_s4 }
 0x621   :  { %v1034_v2 = vpop.xlane.xlu2 %1033 }
 0x622   :  { %v1038_v7 = vsub.f32 %v1030_v48, %v1034_v2 }
 0x624   :  { %v1040_v9 = vmul.f32 1.442695, %v1038_v7 }
 0x626   :  { %1773 = vpow2.f32 %v1040_v9 }
 0x629   :  { %v1037_v11 = vpop.xlane.xlu1 %1036 }
 0x62a   :  { %v1039_v13 = vsub.f32 %v1031_v12, %v1037_v11  ;;  %v1449_v11 = vpop.permute.xlu0 %1448 }
 0x62c   :  { %v1774_v17 = vpop.eup %1773  ;;  %v1042_v15 = vmul.f32 1.442695, %v1039_v13 }
 0x62d   :  { %v1044_v16 = vsel %vm338_vm1, %v1774_v17, 0.0 }
 0x62e   :  { %1775 = vpow2.f32 %v1042_v15  ;;  %1045 = vadd.xlane.f32.xlu2 %v1044_v16 }
 0x634   :  { %v2547_v19 = vpop.eup %1775 }
 0x635   :  { %v1047_v24 = vsel %vm338_vm1, %v2547_v19, 0.0 }
 0x636   :  { %1048 = vadd.xlane.f32.xlu2 %v1047_v24 }
 0x641   :  { %v1110_v61 = vpop.permute.xlu1 %1109 }
 0x649   :  { %v1296_v50 = vpop.permute.xlu1 %1295 }
 0x64e   :  { %1115 = vrot.lane.b32.xlu2 %v2510_v0, %s2016_s13 }
 0x656   :  { %1299 = vrot.lane.b32.xlu2 %v2510_v0, %s2017_s4 }
 0x65e   :  { %1293 = vrot.lane.b32.xlu2 %v944_v3, %s2017_s4 }
 0x666   :  { %1452 = vrot.lane.b32.xlu2 %v2499_v53, %s2018_s15 }
 0x66e   :  { %1450 = vrot.lane.b32.xlu2 %v947_v41, %s2018_s15 }
 0x6a1   :  { %v1046_v62 = vpop.xlane.xlu2 %1045 }
 0x6a2   :  { %1777 = vrcp.f32 %v1046_v62  ;;  %v1061_v36 = vand.u32 2147483648, %v1046_v62  ;;  %v1059_v43 = vand.u32 2147483647, %v1046_v62  ;;  %vm1055_vm7 = vweird.f32 %v1046_v62 }
 0x6a4   :  { %v1062_v33 = vor.u32 1.1754944e-38, %v1061_v36  ;;  %vm1060_vm9 = vcmp.eq.f32.partialorder %v1059_v43, 8.507059e+37 }
 0x6a8   :  { %v1778_v60 = vpop.eup %1777 }
 0x6a9   :  { %v1051_v56 = vmul.f32 %v1778_v60, %v1046_v62  ;;  %v1049_v55 = vpop.xlane.xlu2 %1048  ;;  %vm1056_vm6 = vweird.f32 %v1778_v60 }
 0x6aa   :  { %1779 = vrcp.f32 %v1049_v55  ;;  %vm1057_vm8 = vmor %vm1055_vm7, %vm1056_vm6  ;;  %v1076_v31 = vand.u32 2147483648, %v1049_v55  ;;  %v1074_v41 = vand.u32 2147483647, %v1049_v55  ;;  %vm1070_vm11 = vweird.f32 %v1049_v55 }
 0x6ab   :  { %v1052_v53 = vsub.f32 1.0, %v1051_v56 }
 0x6ac   :  { %v1077_v44 = vor.u32 1.1754944e-38, %v1076_v31  ;;  %vm1075_vm13 = vcmp.eq.f32.partialorder %v1074_v41, 8.507059e+37 }
 0x6ad   :  { %v1053_v0 = vmul.f32 %v1778_v60, %v1052_v53 }
 0x6af   :  { %v1054_v47 = vadd.f32 %v1778_v60, %v1053_v0 }
 0x6b0   :  { %v1780_v49 = vpop.eup %1779 }
 0x6b1   :  { %v1058_v1 = vsel %vm1057_vm8, %v1778_v60, %v1054_v47  ;;  %v1066_v5 = vmul.f32 %v1780_v49, %v1049_v55  ;;  %v1116_v30 = vpop.permute.xlu2 %1115  ;;  %vm1071_vm10 = vweird.f32 %v1780_v49 }
 0x6b2   :  { %v1063_v18 = vsel %vm1060_vm9, %v1062_v33, %v1058_v1  ;;  %1668 = vmatpush.xpose.msk.msra.mxu1 %vm300_vm0, %v1116_v30  ;;  %vm1072_vm12 = vmor %vm1070_vm11, %vm1071_vm10 }
 0x6b3   :  { %v1067_v25 = vsub.f32 1.0, %v1066_v5  ;;  %v1064_v28 = vmul.f32 %v1774_v17, %v1063_v18 }
 0x6b5   :  { %v1068_v37 = vmul.f32 %v1780_v49, %v1067_v25  ;;  %1666 = vmatmul.msk.f32.vlgmr.msrb.gmra.mxu0 %vm338_vm1, %v1064_v28 }
 0x6b6   :  { %1686 = vmatpush.xpose.msk.msrb.mxu0 %vm300_vm0, %v1455_v34  ;;  %1669 = vmatpush.xpose.msk.msra.mxu1 %vm300_vm0, %v1114_v40 }
 0x6b7   :  { %v1069_v3 = vadd.f32 %v1780_v49, %v1068_v37 }
 0x6b9   :  { %v1300_v4 = vpop.permute.xlu2 %1299  ;;  %1670 = vmatmul.msk.f32.vlgmr.msra.gmra.mxu1 %vm300_vm0, %v1110_v61  ;;  %v1073_v45 = vsel %vm1072_vm12, %v1780_v49, %v1069_v3 }
 0x6ba   :  { %1678 = vmatpush.xpose.msk.msrb.mxu1 %vm300_vm0, %v1300_v4  ;;  %v1078_v6 = vsel %vm1075_vm13, %v1077_v44, %v1073_v45 }
 0x6bb   :  { %v1079_v8 = vmul.f32 %v2547_v19, %v1078_v6 }
 0x6bd   :  { %1667 = vmatmul.msk.f32.gmra.mxu0 %vm338_vm1, %v1079_v8 }
 0x6be   :  { %1679 = vmatpush.xpose.msk.msrb.mxu1 %vm300_vm0, %v1298_v26 }
 0x6c1   :  { %v1294_v46 = vpop.permute.xlu2 %1293  ;;  %1671 = vmatmul.msk.f32.gmra.mxu1 %vm300_vm0, %v1112_v59 }
 0x6c9   :  { %v1453_v48 = vpop.permute.xlu2 %1452  ;;  %1680 = vmatmul.msk.f32.vlgmr.msrb.gmra.mxu1 %vm300_vm0, %v1294_v46 }
 0x6ca   :  { %1687 = vmatpush.xpose.msk.msrb.mxu0 %vm300_vm0, %v1453_v48 }
 0x6d1   :  { %1681 = vmatmul.msk.f32.gmra.mxu1 %vm300_vm0, %v1296_v50  ;;  %v1451_v16 = vpop.permute.xlu2 %1450 }
 0x732   :  { %v1103_v10 = vpop.f32.mrf.mxu0 }
 0x733   :  { %1676 = vmatmul.msk.f32.vlgmr.msra.gmra.mxu0 %vm300_vm0, %v1103_v10 }
 0x736   :  { %v1142_v12 = vpop.f32.mrf.mxu1 }
 0x737   :  { %v1148_v14 = vmul.f32 0.17677669, %v1142_v12 }
 0x739   :  { %v1150_v51 = vsel %vm338_vm1, %v1148_v14, -inf }
 0x73a   :  { %v1106_v23 = vpop.f32.mrf.mxu0  ;;  %1151 = vmax.xlane.f32.xlu1 %v1150_v51 }
 0x73b   :  { %1677 = vmatmul.msk.f32.gmra.mxu0 %vm300_vm0, %v1106_v23 }
 0x73e   :  { %v1145_v2 = vpop.f32.mrf.mxu1 }
 0x73f   :  { %v1149_v7 = vmul.f32 0.17677669, %v1145_v2 }
 0x741   :  { %v1153_v9 = vsel %vm338_vm1, %v1149_v7, -inf }
 0x742   :  { %1154 = vmax.xlane.f32.xlu0 %v1153_v9 }
 0x743   :  { %1688 = vmatmul.msk.f32.vlgmr.msrb.gmra.mxu0 %vm300_vm0, %v1449_v11 }
 0x746   :  { %v1326_v13 = vpop.f32.mrf.mxu1 }
 0x747   :  { %v1332_v17 = vmul.f32 0.17677669, %v1326_v13 }
 0x749   :  { %v1334_v15 = vsel %vm338_vm1, %v1332_v17, -inf }
 0x74a   :  { %1335 = vmax.xlane.f32.xlu2 %v1334_v15 }
 0x74b   :  { %1689 = vmatmul.msk.f32.gmra.mxu0 %vm300_vm0, %v1451_v16 }
 0x74e   :  { %v1329_v19 = vpop.f32.mrf.mxu1 }
 0x74f   :  { %v1333_v24 = vmul.f32 0.17677669, %v1329_v19 }
 0x751   :  { %v1337_v20 = vsel %vm338_vm1, %v1333_v24, -inf }
 0x752   :  { %1338 = vmax.xlane.f32.xlu1 %v1337_v20 }
 0x7ad   :  { %v1152_v22 = vpop.xlane.xlu1 %1151 }
 0x7ae   :  { %v1156_v29 = vsub.f32 %v1148_v14, %v1152_v22 }
 0x7b0   :  { %v1158_v58 = vmul.f32 1.442695, %v1156_v29  ;;  %v2588_v39 = vpop.f32.mrf.mxu0 }
 0x7b2   :  { %1781 = vpow2.f32 %v1158_v58 }
 0x7b5   :  { %v1155_v63 = vpop.xlane.xlu0 %1154 }
 0x7b6   :  { %v1157_v40 = vsub.f32 %v1149_v7, %v1155_v63 }
 0x7b8   :  { %v2590_v32 = vpop.eup %1781  ;;  %v2592_v35 = vpop.f32.mrf.mxu0  ;;  %v1160_v59 = vmul.f32 1.442695, %v1157_v40 }
 0x7b9   :  { %v1162_v38 = vsel %vm338_vm1, %v2590_v32, 0.0 }
 0x7ba   :  { %1163 = vadd.xlane.f32.xlu1 %v1162_v38  ;;  %1783 = vpow2.f32 %v1160_v59 }
 0x7bd   :  { %v1336_v62 = vpop.xlane.xlu2 %1335 }
 0x7be   :  { %v1340_v56 = vsub.f32 %v1332_v17, %v1336_v62 }
 0x7c0   :  { %v1481_v60 = vpop.f32.mrf.mxu0  ;;  %v1342_v53 = vmul.f32 1.442695, %v1340_v56  ;;  %v2597_v43 = vpop.eup %1783 }
 0x7c1   :  { %v1487_v55 = vmul.f32 0.17677669, %v1481_v60  ;;  %v1165_v5 = vsel %vm338_vm1, %v2597_v43, 0.0 }
 0x7c2   :  { %1785 = vpow2.f32 %v1342_v53 }
 0x7c3   :  { %v1489_v26 = vsel %vm338_vm1, %v1487_v55, -inf }
 0x7c4   :  { %1490 = vmax.xlane.f32.xlu0 %v1489_v26 }
 0x7c5   :  { %v1339_v36 = vpop.xlane.xlu1 %1338 }
 0x7c6   :  { %v1341_v0 = vsub.f32 %v1333_v24, %v1339_v36 }
 0x7c8   :  { %v1344_v47 = vmul.f32 1.442695, %v1341_v0  ;;  %v1484_v49 = vpop.f32.mrf.mxu0  ;;  %v2602_v30 = vpop.eup %1785 }
 0x7c9   :  { %v1488_v33 = vmul.f32 0.17677669, %v1484_v49  ;;  %v1346_v25 = vsel %vm338_vm1, %v2602_v30, 0.0 }
 0x7ca   :  { %1787 = vpow2.f32 %v1344_v47 }
 0x7cb   :  { %v1492_v1 = vsel %vm338_vm1, %v1488_v33, -inf }
 0x7cc   :  { %1493 = vmax.xlane.f32.xlu2 %v1492_v1  ;;  %1166 = vadd.xlane.f32.xlu0 %v1165_v5 }
 0x7d0   :  { %v2604_v18 = vpop.eup %1787 }
 0x7d1   :  { %v1349_v28 = vsel %vm338_vm1, %v2604_v18, 0.0 }
 0x7d3   :  { %1723 = vrot.lane.b32.xlu1 %v2561_v57, %s2016_s13 }
 0x7d4   :  { %1347 = vadd.xlane.f32.xlu2 %v1346_v25  ;;  %1350 = vadd.xlane.f32.xlu0 %v1349_v28 }
 0x82d   :  { %v1164_v31 = vpop.xlane.xlu1 %1163 }
 0x82e   :  { %1789 = vrcp.f32 %v1164_v31  ;;  %v1179_v46 = vand.u32 2147483648, %v1164_v31  ;;  %vm1173_vm15 = vweird.f32 %v1164_v31  ;;  %v1177_v50 = vand.u32 2147483647, %v1164_v31 }
 0x830   :  { %v1180_v23 = vor.u32 1.1754944e-38, %v1179_v46  ;;  %vm1178_vm3 = vcmp.eq.f32.partialorder %v1177_v50, 8.507059e+37 }
 0x834   :  { %v1790_v34 = vpop.eup %1789 }
 0x835   :  { %v1169_v37 = vmul.f32 %v1790_v34, %v1164_v31  ;;  %vm1174_vm14 = vweird.f32 %v1790_v34 }
 0x836   :  { %vm1175_vm2 = vmor %vm1173_vm15, %vm1174_vm14 }
 0x837   :  { %v1170_v41 = vsub.f32 1.0, %v1169_v37  ;;  %v1491_v3 = vpop.xlane.xlu0 %1490 }
 0x838   :  { %v1495_v61 = vsub.f32 %v1487_v55, %v1491_v3 }
 0x839   :  { %v1171_v4 = vmul.f32 %v1790_v34, %v1170_v41 }
 0x83a   :  { %v1497_v44 = vmul.f32 1.442695, %v1495_v61 }
 0x83b   :  { %v1172_v45 = vadd.f32 %v1790_v34, %v1171_v4 }
 0x83c   :  { %1791 = vpow2.f32 %v1497_v44 }
 0x83d   :  { %v1176_v14 = vsel %vm1175_vm2, %v1790_v34, %v1172_v45 }
 0x83e   :  { %v1181_v9 = vsel %vm1178_vm3, %v1180_v23, %v1176_v14 }
 0x83f   :  { %v1494_v6 = vpop.xlane.xlu2 %1493  ;;  %v1167_v8 = vpop.xlane.xlu0 %1166  ;;  %v1182_v16 = vmul.f32 %v2590_v32, %v1181_v9 }
 0x840   :  { %v1496_v48 = vsub.f32 %v1488_v33, %v1494_v6  ;;  %1793 = vrcp.f32 %v1167_v8  ;;  %v1194_v24 = vand.u32 2147483648, %v1167_v8  ;;  %v1192_v29 = vand.u32 2147483647, %v1167_v8 }
 0x841   :  { %vm1188_vm5 = vweird.f32 %v1167_v8 }
 0x842   :  { %v2612_v10 = vpop.eup %1791  ;;  %v1499_v12 = vmul.f32 1.442695, %v1496_v48  ;;  %v1195_v63 = vor.u32 1.1754944e-38, %v1194_v24  ;;  %vm1193_vm7 = vcmp.eq.f32.partialorder %v1192_v29, 8.507059e+37 }
 0x843   :  { %v1501_v51 = vsel %vm338_vm1, %v2612_v10, 0.0 }
 0x844   :  { %1795 = vpow2.f32 %v1499_v12  ;;  %1502 = vadd.xlane.f32.xlu2 %v1501_v51 }
 0x845   :  { %v1724_v2 = vpop.permute.xlu1 %1723 }
 0x846   :  { %v1794_v7 = vpop.eup %1793  ;;  %v1725_v11 = vunpack.i.l.bf16 %v1724_v2  ;;  %v1726_v17 = vunpack.i.h.bf16 %v1724_v2 }
 0x847   :  { %v1184_v13 = vmul.f32 %v1794_v7, %v1167_v8  ;;  %vm1189_vm4 = vweird.f32 %v1794_v7  ;;  %v1348_v59 = vpop.xlane.xlu2 %1347  ;;  %v1351_v62 = vpop.xlane.xlu0 %1350 }
 0x848   :  { %1226 = vmatpush.msra.mxu2 %v1725_v11  ;;  %vm1190_vm6 = vmor %vm1188_vm5, %vm1189_vm4  ;;  %1797 = vrcp.f32 %v1348_v59  ;;  %v1363_v49 = vand.u32 2147483648, %v1348_v59  ;;  %vm1357_vm9 = vweird.f32 %v1348_v59  ;;  %v1361_v33 = vand.u32 2147483647, %v1348_v59 }
 0x849   :  { %v1185_v15 = vsub.f32 1.0, %v1184_v13  ;;  %1799 = vrcp.f32 %v1351_v62  ;;  %v1378_v61 = vand.u32 2147483648, %v1351_v62  ;;  %vm1372_vm13 = vweird.f32 %v1351_v62 }
 0x84a   :  { %v2617_v19 = vpop.eup %1795  ;;  %1227 = vmatpush.msra.mxu2 %v1726_v17  ;;  %v1364_v25 = vor.u32 1.1754944e-38, %v1363_v49  ;;  %vm1362_vm11 = vcmp.eq.f32.partialorder %v1361_v33, 8.507059e+37  ;;  %v1376_v45 = vand.u32 2147483647, %v1351_v62 }
 0x84b   :  { %v1186_v20 = vmul.f32 %v1794_v7, %v1185_v15  ;;  %1672 = vmatmul.msk.f32.vlgmr.msra.gmra.mxu2 %vm338_vm1, %v1182_v16  ;;  %v1504_v22 = vsel %vm338_vm1, %v2617_v19, 0.0  ;;  %v1379_v48 = vor.u32 1.1754944e-38, %v1378_v61 }
 0x84c   :  { %1505 = vadd.xlane.f32.xlu0 %v1504_v22  ;;  %vm1377_vm15 = vcmp.eq.f32.partialorder %v1376_v45, 8.507059e+37 }
 0x84d   :  { %v1187_v58 = vadd.f32 %v1794_v7, %v1186_v20 }
 0x84e   :  { %v1798_v60 = vpop.eup %1797 }
 0x84f   :  { %v1191_v38 = vsel %vm1190_vm6, %v1794_v7, %v1187_v58  ;;  %v1353_v56 = vmul.f32 %v1798_v60, %v1348_v59  ;;  %v1800_v26 = vpop.eup %1799  ;;  %vm1358_vm8 = vweird.f32 %v1798_v60 }
 0x850   :  { %v1196_v32 = vsel %vm1193_vm7, %v1195_v63, %v1191_v38  ;;  %v1368_v36 = vmul.f32 %v1800_v26, %v1351_v62  ;;  %vm1359_vm10 = vmor %vm1357_vm9, %vm1358_vm8  ;;  %vm1373_vm12 = vweird.f32 %v1800_v26 }
 0x851   :  { %v1197_v40 = vmul.f32 %v2597_v43, %v1196_v32  ;;  %v1354_v55 = vsub.f32 1.0, %v1353_v56  ;;  %vm1374_vm14 = vmor %vm1372_vm13, %vm1373_vm12 }
 0x852   :  { %v1369_v47 = vsub.f32 1.0, %v1368_v36 }
 0x853   :  { %1673 = vmatmul.msk.f32.gmra.mxu2 %vm338_vm1, %v1197_v40  ;;  %v1355_v53 = vmul.f32 %v1798_v60, %v1354_v55 }
 0x854   :  { %v1370_v1 = vmul.f32 %v1800_v26, %v1369_v47 }
 0x855   :  { %v1356_v43 = vadd.f32 %v1798_v60, %v1355_v53 }
 0x856   :  { %v1371_v3 = vadd.f32 %v1800_v26, %v1370_v1 }
 0x858   :  { %v1375_v8 = vsel %vm1374_vm14, %v1800_v26, %v1371_v3 }
 0x859   :  { %v1380_v14 = vsel %vm1377_vm15, %v1379_v48, %v1375_v8 }
 0x85c   :  { %1728 = vrot.lane.b32.xlu2 %v2561_v57, %s2017_s4 }
 0x860   :  { %1733 = vrot.lane.b32.xlu0 %v2561_v57, %s2018_s15  ;;  %v1360_v57 = vsel %vm1359_vm10, %v1798_v60, %v1356_v43 }
 0x861   :  { %v1365_v34 = vsel %vm1362_vm11, %v1364_v25, %v1360_v57 }
 0x862   :  { %v1366_v4 = vmul.f32 %v2602_v30, %v1365_v34  ;;  %v1381_v30 = vmul.f32 %v2604_v18, %v1380_v14 }
 0x8b7   :  { %v1503_v0 = vpop.xlane.xlu2 %1502 }
 0x8b8   :  { %1801 = vrcp.f32 %v1503_v0  ;;  %v1518_v2 = vand.u32 2147483648, %v1503_v0  ;;  %vm1512_vm3 = vweird.f32 %v1503_v0 }
 0x8ba   :  { %v1519_v11 = vor.u32 1.1754944e-38, %v1518_v2 }
 0x8be   :  { %v1802_v5 = vpop.eup %1801 }
 0x8bf   :  { %v1729_v28 = vpop.permute.xlu2 %1728  ;;  %v1506_v31 = vpop.xlane.xlu0 %1505  ;;  %v1508_v37 = vmul.f32 %v1802_v5, %v1503_v0  ;;  %vm1513_vm2 = vweird.f32 %v1802_v5 }
 0x8c0   :  { %v1730_v41 = vunpack.i.l.bf16 %v1729_v28  ;;  %1803 = vrcp.f32 %v1506_v31  ;;  %v1731_v44 = vunpack.i.h.bf16 %v1729_v28  ;;  %vm1514_vm4 = vmor %vm1512_vm3, %vm1513_vm2  ;;  %v1533_v15 = vand.u32 2147483648, %v1506_v31 }
 0x8c1   :  { %v1509_v6 = vsub.f32 1.0, %v1508_v37  ;;  %vm1527_vm7 = vweird.f32 %v1506_v31  ;;  %v1531_v20 = vand.u32 2147483647, %v1506_v31 }
 0x8c2   :  { %1408 = vmatpush.msrb.mxu2 %v1730_v41  ;;  %v1534_v29 = vor.u32 1.1754944e-38, %v1533_v15 }
 0x8c3   :  { %v1510_v50 = vmul.f32 %v1802_v5, %v1509_v6  ;;  %vm1532_vm9 = vcmp.eq.f32.partialorder %v1531_v20, 8.507059e+37 }
 0x8c4   :  { %1409 = vmatpush.msrb.mxu2 %v1731_v44 }
 0x8c5   :  { %1682 = vmatmul.msk.f32.vlgmr.msrb.gmra.mxu2 %vm338_vm1, %v1366_v4  ;;  %v1511_v51 = vadd.f32 %v1802_v5, %v1510_v50 }
 0x8c6   :  { %v1804_v46 = vpop.eup %1803  ;;  %1590 = vmatpush.msra.mxu2 %v2493_v42  ;;  %v1516_v42 = vand.u32 2147483647, %v1503_v0 }
 0x8c7   :  { %v1523_v12 = vmul.f32 %v1804_v46, %v1506_v31  ;;  %v1515_v9 = vsel %vm1514_vm4, %v1802_v5, %v1511_v51  ;;  %vm1528_vm6 = vweird.f32 %v1804_v46 }
 0x8c8   :  { %1591 = vmatpush.msra.mxu2 %v2495_v27  ;;  %vm1517_vm5 = vcmp.eq.f32.partialorder %v1516_v42, 8.507059e+37  ;;  %vm1529_vm8 = vmor %vm1527_vm7, %vm1528_vm6 }
 0x8c9   :  { %v1524_v23 = vsub.f32 1.0, %v1523_v12  ;;  %v1520_v18 = vsel %vm1517_vm5, %v1519_v11, %v1515_v9 }
 0x8ca   :  { %1592 = vmatpush.msra.mxu2 %v2504_v21  ;;  %v1521_v24 = vmul.f32 %v2612_v10, %v1520_v18 }
 0x8cb   :  { %v1525_v27 = vmul.f32 %v1804_v46, %v1524_v23 }
 0x8cc   :  { %1593 = vmatpush.msra.mxu2 %v2506_v52 }
 0x8cd   :  { %1683 = vmatmul.msk.f32.gmra.mxu2 %vm338_vm1, %v1381_v30  ;;  %v1526_v17 = vadd.f32 %v1804_v46, %v1525_v27 }
 0x8ce   :  { %v1229_v7 = vpop.f32.mrf.mxu2 }
 0x8cf   :  { %1674 = vmatmul.msk.f32.vlgmr.msra.gmra.mxu3 %vm300_vm0, %v1229_v7  ;;  %v1530_v22 = vsel %vm1529_vm8, %v1804_v46, %v1526_v17 }
 0x8d0   :  { %v1535_v58 = vsel %vm1532_vm9, %v1534_v29, %v1530_v22 }
 0x8d1   :  { %v1536_v63 = vmul.f32 %v2617_v19, %v1535_v58 }
 0x8d2   :  { %v1734_v21 = vpop.permute.xlu0 %1733 }
 0x8d3   :  { %v1735_v13 = vunpack.i.l.bf16 %v1734_v21  ;;  %v1736_v52 = vunpack.i.h.bf16 %v1734_v21 }
 0x8d5   :  { %1563 = vmatpush.msra.mxu1 %v1735_v13 }
 0x8d6   :  { %v1232_v16 = vpop.f32.mrf.mxu2 }
 0x8d7   :  { %1675 = vmatmul.msk.f32.gmra.mxu3 %vm300_vm0, %v1232_v16  ;;  %1564 = vmatpush.msra.mxu1 %v1736_v52 }
 0x8d8   :  { %1690 = vmatmul.msk.f32.vlgmr.msra.gmra.mxu1 %vm338_vm1, %v1521_v24 }
 0x8e0   :  { %1691 = vmatmul.msk.f32.gmra.mxu1 %vm338_vm1, %v1536_v63 }
 0x948   :  { %v1411_v38 = vpop.f32.mrf.mxu2 }
 0x949   :  { %1684 = vmatmul.msk.f32.vlgmr.msrb.gmra.mxu3 %vm300_vm0, %v1411_v38 }
 0x950   :  { %v1414_v32 = vpop.f32.mrf.mxu2 }
 0x951   :  { %1685 = vmatmul.msk.f32.gmra.mxu3 %vm300_vm0, %v1414_v32 }
 0x952   :  { %v1258_v59 = vpop.f32.mrf.mxu3 }
 0x953   :  { %v1288_v56 = vadd.f32 %v2588_v39, %v1258_v59 }
 0x955   :  { %v1566_v10 = vpop.f32.mrf.mxu1 }
 0x956   :  { %1692 = vmatmul.msk.f32.vlgmr.msra.gmra.mxu2 %vm300_vm0, %v1566_v10 }
 0x95a   :  { %v1261_v62 = vpop.f32.mrf.mxu3 }
 0x95b   :  { %v1291_v0 = vadd.f32 %v2592_v35, %v1261_v62 }
 0x95d   :  { %v1569_v40 = vpop.f32.mrf.mxu1 }
 0x95e   :  { %1693 = vmatmul.msk.f32.gmra.mxu2 %vm300_vm0, %v1569_v40 }
 0x9cc   :  { %v1440_v60 = vpop.f32.mrf.mxu3 }
 0x9cd   :  { %v1446_v19 = vadd.f32 %v1440_v60, %v1288_v56 }
 0x9d4   :  { %v1443_v36 = vpop.f32.mrf.mxu3 }
 0x9d5   :  { %v1447_v43 = vadd.f32 %v1443_v36, %v1291_v0 }
 0x9d9   :  { %v1595_v55 = vpop.f32.mrf.mxu2 }
 0x9da   :  { %v1601_v26 = vadd.f32 %v1595_v55, %v1446_v19 }
 0x9dc   :  { %v1603_v53 = vadd.f32 %v2534_v54, %v1601_v26 }
 0x9de   :  { %1606 = vst [vmem:[#allocation14 + $0x10] sm:$0xff] %v1603_v53 }
 0x9e1   :  { %v1598_v47 = vpop.f32.mrf.mxu2 }
 0x9e2   :  { %v1602_v49 = vadd.f32 %v1598_v47, %v1447_v43 }
 0x9e4   :  { %v1604_v39 = vadd.f32 %v2534_v54, %v1602_v49 }
 0x9e6   :  { %1607 = vst [vmem:[#allocation14 + $0x18] sm:$0xff] %v1604_v39 }
 0x9e7   :  { %1620 = dma.vmem_to_hbm [thread:$0]  %s1613_s7, 512, %s1615_s19, [#allocation4], %s2008_s25, %s2008_s25, %s2009_s26  }
 0x9e8   :  { %2005 = dma.done.wait [#allocation4], 512  }
 0x9e9   :  { %2006 = vsyncadd [#allocation4], 4294966784 }
 0x9ea   :  { %1625 = vsyncpa [#allocation3], 1 }
 0x9eb   :  { %1626 = vsyncpa [#allocation6], 1 }
 0x9ec   :  { %1627 = vsyncpa [#allocation9], 1 }
 0x9ed   :  { %1628 = vsyncpa [#allocation12], 1 }
 0x9ee   :  { %1629 = vsyncpa [#allocation4], 1 }

</bundles_post_ra>
